<compile_context>
chip_gen: v6e
topology: v6e:2x2x1
jax: 0.10.0
libtpu: 0.0.40
codegen_flags: <defaults>
</compile_context>

<pallas_src>
import functools

import jax
import jax.numpy as jnp
from jax.experimental import pallas as pl
from jax.experimental.pallas import tpu as pltpu


# --------------------------------------------------------------------------
# Pure-JAX reference (PyTorch gate order i, f, g, o) -- used for verification.
# --------------------------------------------------------------------------
def _lstm_cell_ref(x, h, c, w_ih, w_hh, b):
    hidden = h.shape[-1]
    gates = jnp.dot(x, w_ih) + jnp.dot(h, w_hh) + b
    i = jax.nn.sigmoid(gates[:, 0 * hidden:1 * hidden])
    f = jax.nn.sigmoid(gates[:, 1 * hidden:2 * hidden])
    g = jnp.tanh(gates[:, 2 * hidden:3 * hidden])
    o = jax.nn.sigmoid(gates[:, 3 * hidden:4 * hidden])
    c_new = f * c + i * g
    h_new = o * jnp.tanh(c_new)
    return h_new, c_new


def _reference_forward(x, h1, c1, h2, c2, params):
    batch, length = x.shape[0], x.shape[1]
    x = x.reshape(batch, length, -1).astype(jnp.float32)
    for i in range(length):
        d = x[:, i]
        h1, c1 = _lstm_cell_ref(d, h1, c1, params["wih1"], params["whh1"], params["b1"])
        h2, c2 = _lstm_cell_ref(h1, h2, c2, params["wih2"], params["whh2"], params["b2"])
    return jnp.dot(h2, params["wfc"]) + params["bfc"]


# --------------------------------------------------------------------------
# Pallas kernel: whole recurrence + final FC in a single grid step.
# Gate column layout inside the kernel is (i, f, o, g).
# --------------------------------------------------------------------------
def _stacked_rnn_kernel(
    gx1_ref,                # (length, batch, 4H)  x_t @ wih1 + b1, precomputed
    h1_ref, c1_ref,         # (batch, H) initial states, layer 1
    h2_ref, c2_ref,         # (batch, H) initial states, layer 2
    whh1_ref,               # (H, 4H)   layer-1 recurrent weight
    wih2_ref,               # (H, 4H)   layer-2 input weight
    whh2_ref,               # (H, 4H)   layer-2 recurrent weight
    b2_ref,                 # (1, 4H)   layer-2 fused bias
    wfc_ref,                # (H, pad_n) zero-padded FC weight (lane-dense)
    bfc_ref,                # (1, pad_n) zero-padded FC bias
    out_ref,                # (batch, pad_n) padded logits
):
    length, batch, four_h = gx1_ref.shape
    hidden = four_h // 4

    # Hoist weight reads / bias broadcast out of the unrolled loop.
    whh1 = whh1_ref[...]
    wih2 = wih2_ref[...]
    whh2 = whh2_ref[...]
    b2 = jnp.broadcast_to(b2_ref[...], (batch, four_h))

    h1 = h1_ref[...]
    c1 = c1_ref[...]
    h2 = h2_ref[...]
    c2 = c2_ref[...]

    def cell(gates, c):
        # Gate layout (i, f, o, g): one contiguous sigmoid slice, one tanh slice.
        sig = jax.nn.sigmoid(gates[:, : 3 * hidden])
        g = jnp.tanh(gates[:, 3 * hidden:])
        i = sig[:, 0 * hidden:1 * hidden]
        f = sig[:, 1 * hidden:2 * hidden]
        o = sig[:, 2 * hidden:3 * hidden]
        c_new = f * c + i * g
        h_new = o * jnp.tanh(c_new)
        return h_new, c_new

    # Fully unrolled time loop (length is small and static).
    for t in range(length):
        # Layer-2 recurrent dot depends only on h2_{t-1}: issue it FIRST so it
        # overlaps with layer-1's step-t critical path (split dot, no concat).
        rec2 = jnp.dot(h2, whh2, preferred_element_type=jnp.float32)

        # Layer 1: input projection precomputed; only the recurrent dot sits on
        # the serial chain.  gx1_ref[t] is a contiguous (batch, 4H) slab.
        gates1 = gx1_ref[t] + jnp.dot(h1, whh1, preferred_element_type=jnp.float32)
        h1, c1 = cell(gates1, c1)

        # TODO(synk): 'train' mode applies F.dropout(h1) here; only 'val'
        # (no dropout) semantics are implemented in-kernel.

        # Layer 2.
        gates2 = jnp.dot(h1, wih2, preferred_element_type=jnp.float32) + rec2 + b2
        h2, c2 = cell(gates2, c2)

    # Final FC fused into the kernel epilogue; output is lane-dense (pad_n=128k).
    out_ref[...] = (
        jnp.dot(h2, wfc_ref[...], preferred_element_type=jnp.float32) + bfc_ref[...]
    )


# --------------------------------------------------------------------------
# Parameters (PyTorch convention: gate order i,f,g,o, weights pre-transposed
# to (in, out), biases fused).
# --------------------------------------------------------------------------
def init_params(key, input_size, hidden_size, num_class):
    ks = jax.random.split(key, 8)
    s = 1.0 / jnp.sqrt(hidden_size)

    def u(k, shape):
        return jax.random.uniform(k, shape, jnp.float32, -s, s)

    return dict(
        wih1=u(ks[0], (input_size, 4 * hidden_size)),
        whh1=u(ks[1], (hidden_size, 4 * hidden_size)),
        b1=u(ks[2], (1, 4 * hidden_size)),        # b_ih + b_hh fused
        wih2=u(ks[3], (hidden_size, 4 * hidden_size)),
        whh2=u(ks[4], (hidden_size, 4 * hidden_size)),
        b2=u(ks[5], (1, 4 * hidden_size)),
        wfc=u(ks[6], (hidden_size, num_class)),
        bfc=u(ks[7], (1, num_class)),
    )


def _reorder_gates(w, hidden):
    """Reorder last-axis gate columns from (i, f, g, o) to (i, f, o, g)."""
    return jnp.concatenate(
        [
            w[..., : 2 * hidden],                  # i, f
            w[..., 3 * hidden: 4 * hidden],        # o
            w[..., 2 * hidden: 3 * hidden],        # g
        ],
        axis=-1,
    )


def prepare_params(params, hidden, num_class):
    """One-time parameter re-layout (hoisted OUT of the jitted forward)."""
    pad_n = ((num_class + 127) // 128) * 128
    wfc_pad = jnp.zeros((hidden, pad_n), jnp.float32).at[:, :num_class].set(
        params["wfc"].astype(jnp.float32)
    )
    bfc_pad = jnp.zeros((1, pad_n), jnp.float32).at[:, :num_class].set(
        params["bfc"].astype(jnp.float32)
    )
    return dict(
        wih1=_reorder_gates(params["wih1"], hidden),
        whh1=_reorder_gates(params["whh1"], hidden),
        b1=_reorder_gates(params["b1"], hidden),
        wih2=_reorder_gates(params["wih2"], hidden),
        whh2=_reorder_gates(params["whh2"], hidden),
        b2=_reorder_gates(params["b2"], hidden),
        wfc=wfc_pad,
        bfc=bfc_pad,
    )


# --------------------------------------------------------------------------
# Wrapper
# --------------------------------------------------------------------------
@functools.partial(jax.jit, static_argnames=("num_class", "mode"))
def stacked_rnn_forward(x, h1, c1, h2, c2, prepped, num_class, mode="val"):
    assert mode in ("train", "val"), "mode undefined"
    batch, length = x.shape[0], x.shape[1]
    x = x.reshape(batch, length, -1).astype(jnp.float32)
    input_size = x.shape[2]
    hidden = h1.shape[1]
    assert prepped["wih1"].shape[0] == input_size, "input size not match"
    four_h = 4 * hidden
    pad_n = prepped["wfc"].shape[1]

    # Layer-1 input projections for all t as one big matmul, laid out
    # (length, batch, 4H) so the kernel reads a contiguous slab per step.
    xt = jnp.transpose(x, (1, 0, 2))                       # (L, B, I)
    gx1 = (
        jnp.dot(xt.reshape(length * batch, input_size), prepped["wih1"],
                preferred_element_type=jnp.float32)
        .reshape(length, batch, four_h)
        + prepped["b1"]
    )

    def full(shape):
        return pl.BlockSpec(shape, lambda i: tuple(0 for _ in shape))

    grid_spec = pltpu.PrefetchScalarGridSpec(
        num_scalar_prefetch=0,
        grid=(1,),  # whole recurrence in a single grid step
        in_specs=[
            full((length, batch, four_h)),   # gx1
            full((batch, hidden)),           # h1_0
            full((batch, hidden)),           # c1_0
            full((batch, hidden)),           # h2_0
            full((batch, hidden)),           # c2_0
            full((hidden, four_h)),          # whh1
            full((hidden, four_h)),          # wih2
            full((hidden, four_h)),          # whh2
            full((1, four_h)),               # b2
            full((hidden, pad_n)),           # wfc (padded)
            full((1, pad_n)),                # bfc (padded)
        ],
        out_specs=full((batch, pad_n)),
    )

    logits_pad = pl.pallas_call(
        _stacked_rnn_kernel,
        out_shape=jax.ShapeDtypeStruct((batch, pad_n), jnp.float32),
        grid_spec=grid_spec,
        compiler_params=pltpu.CompilerParams(
            dimension_semantics=("arbitrary",),
        ),
    )(
        gx1, h1, c1, h2, c2,
        prepped["whh1"], prepped["wih2"], prepped["whh2"], prepped["b2"],
        prepped["wfc"], prepped["bfc"],
    )

    return logits_pad[:, :num_class]


# --------------------------------------------------------------------------
if __name__ == "__main__":
    batch = 2
    length = 8
    H_sp, W_sp = 4, 4                  # spatial dims -> input_size = 16
    input_size = H_sp * W_sp
    hidden_size = 32
    num_class = 10

    key = jax.random.PRNGKey(0)
    kx, kh1, kc1, kh2, kc2, kp = jax.random.split(key, 6)

    x = jax.random.normal(kx, (batch, length, H_sp, W_sp), jnp.float32)
    h1 = jax.random.normal(kh1, (batch, hidden_size), jnp.float32)
    c1 = jax.random.normal(kc1, (batch, hidden_size), jnp.float32)
    h2 = jax.random.normal(kh2, (batch, hidden_size), jnp.float32)
    c2 = jax.random.normal(kc2, (batch, hidden_size), jnp.float32)

    params = init_params(kp, input_size, hidden_size, num_class)
    prepped = prepare_params(params, hidden_size, num_class)   # one-time prep

    out = stacked_rnn_forward(x, h1, c1, h2, c2, prepped, num_class, mode="val")
    out = jax.block_until_ready(out)

    ref = _reference_forward(x, h1, c1, h2, c2, params)
    assert out.shape == (batch, num_class)
    assert jnp.allclose(out, ref, atol=1e-4, rtol=1e-4), "mismatch vs reference"

    print("KERNEL_OK")
</pallas_src>

<mosaic_0001>
module attributes {stable_mosaic.version = 11 : i64} {
  func.func @_stacked_rnn_kernel(%arg0: i32, %arg1: memref<8x2x128xf32, #tpu.memory_space<vmem>>, %arg2: memref<2x32xf32, #tpu.memory_space<vmem>>, %arg3: memref<2x32xf32, #tpu.memory_space<vmem>>, %arg4: memref<2x32xf32, #tpu.memory_space<vmem>>, %arg5: memref<2x32xf32, #tpu.memory_space<vmem>>, %arg6: memref<32x128xf32, #tpu.memory_space<vmem>>, %arg7: memref<32x128xf32, #tpu.memory_space<vmem>>, %arg8: memref<32x128xf32, #tpu.memory_space<vmem>>, %arg9: memref<1x128xf32, #tpu.memory_space<vmem>>, %arg10: memref<32x128xf32, #tpu.memory_space<vmem>>, %arg11: memref<1x128xf32, #tpu.memory_space<vmem>>, %arg12: memref<2x128xf32, #tpu.memory_space<vmem>>) attributes {dimension_semantics = [#tpu.dimension_semantics<arbitrary>], iteration_bounds = array<i64: 1>, scalar_prefetch = 0 : i64, scratch_operands = 0 : i64, tpu.core_type = #tpu.core_type<tc>, window_params = [{pipeline_mode = #tpu.pipeline_mode<synchronous>, transform_indices = @transform_0, window_bounds = array<i64: 8, 2, 128>}, {pipeline_mode = #tpu.pipeline_mode<synchronous>, transform_indices = @transform_1, window_bounds = array<i64: 2, 32>}, {pipeline_mode = #tpu.pipeline_mode<synchronous>, transform_indices = @transform_2, window_bounds = array<i64: 2, 32>}, {pipeline_mode = #tpu.pipeline_mode<synchronous>, transform_indices = @transform_3, window_bounds = array<i64: 2, 32>}, {pipeline_mode = #tpu.pipeline_mode<synchronous>, transform_indices = @transform_4, window_bounds = array<i64: 2, 32>}, {pipeline_mode = #tpu.pipeline_mode<synchronous>, transform_indices = @transform_5, window_bounds = array<i64: 32, 128>}, {pipeline_mode = #tpu.pipeline_mode<synchronous>, transform_indices = @transform_6, window_bounds = array<i64: 32, 128>}, {pipeline_mode = #tpu.pipeline_mode<synchronous>, transform_indices = @transform_7, window_bounds = array<i64: 32, 128>}, {pipeline_mode = #tpu.pipeline_mode<synchronous>, transform_indices = @transform_8, window_bounds = array<i64: 1, 128>}, {pipeline_mode = #tpu.pipeline_mode<synchronous>, transform_indices = @transform_9, window_bounds = array<i64: 32, 128>}, {pipeline_mode = #tpu.pipeline_mode<synchronous>, transform_indices = @transform_10, window_bounds = array<i64: 1, 128>}, {pipeline_mode = #tpu.pipeline_mode<synchronous>, transform_indices = @transform_11, window_bounds = array<i64: 2, 128>}]} {
    %c0 = arith.constant 0 : index
    %c0_0 = arith.constant 0 : index
    %0 = vector.load %arg6[%c0, %c0_0] : memref<32x128xf32, #tpu.memory_space<vmem>>, vector<32x128xf32>
    %c0_1 = arith.constant 0 : index
    %c0_2 = arith.constant 0 : index
    %1 = vector.load %arg7[%c0_1, %c0_2] : memref<32x128xf32, #tpu.memory_space<vmem>>, vector<32x128xf32>
    %c0_3 = arith.constant 0 : index
    %c0_4 = arith.constant 0 : index
    %2 = vector.load %arg8[%c0_3, %c0_4] : memref<32x128xf32, #tpu.memory_space<vmem>>, vector<32x128xf32>
    %c0_5 = arith.constant 0 : index
    %c0_6 = arith.constant 0 : index
    %3 = vector.load %arg9[%c0_5, %c0_6] : memref<1x128xf32, #tpu.memory_space<vmem>>, vector<1x128xf32>
    %4 = vector.shape_cast %3 : vector<1x128xf32> to vector<1x128xf32>
    %5 = vector.broadcast %4 : vector<1x128xf32> to vector<2x128xf32>
    %c0_7 = arith.constant 0 : index
    %c0_8 = arith.constant 0 : index
    %6 = vector.load %arg2[%c0_7, %c0_8] : memref<2x32xf32, #tpu.memory_space<vmem>>, vector<2x32xf32>
    %c0_9 = arith.constant 0 : index
    %c0_10 = arith.constant 0 : index
    %7 = vector.load %arg3[%c0_9, %c0_10] : memref<2x32xf32, #tpu.memory_space<vmem>>, vector<2x32xf32>
    %c0_11 = arith.constant 0 : index
    %c0_12 = arith.constant 0 : index
    %8 = vector.load %arg4[%c0_11, %c0_12] : memref<2x32xf32, #tpu.memory_space<vmem>>, vector<2x32xf32>
    %c0_13 = arith.constant 0 : index
    %c0_14 = arith.constant 0 : index
    %9 = vector.load %arg5[%c0_13, %c0_14] : memref<2x32xf32, #tpu.memory_space<vmem>>, vector<2x32xf32>
    %cst = arith.constant dense<0.000000e+00> : vector<2x128xf32>
    %10 = tpu.matmul %8, %2, %cst {dimension_numbers = #tpu.dot_dimension_numbers<[1], [0], [0], [1], [0, 0, 1, 1], [], []>} : vector<2x32xf32>, vector<32x128xf32>, vector<2x128xf32> -> vector<2x128xf32>
    %c0_15 = arith.constant 0 : index
    %c0_16 = arith.constant 0 : index
    %c0_17 = arith.constant 0 : index
    %11 = vector.load %arg1[%c0_15, %c0_16, %c0_17] : memref<8x2x128xf32, #tpu.memory_space<vmem>>, vector<1x2x128xf32>
    %12 = vector.shape_cast %11 : vector<1x2x128xf32> to vector<2x128xf32>
    %cst_18 = arith.constant dense<0.000000e+00> : vector<2x128xf32>
    %13 = tpu.matmul %6, %0, %cst_18 {dimension_numbers = #tpu.dot_dimension_numbers<[1], [0], [0], [1], [0, 0, 1, 1], [], []>} : vector<2x32xf32>, vector<32x128xf32>, vector<2x128xf32> -> vector<2x128xf32>
    %14 = arith.addf %12, %13 : vector<2x128xf32>
    %15 = vector.extract_strided_slice %14 {offsets = [0, 0], sizes = [2, 96], strides = [1, 1]} : vector<2x128xf32> to vector<2x96xf32>
    %16 = arith.negf %15 : vector<2x96xf32>
    %17 = math.exp %16 : vector<2x96xf32>
    %cst_19 = arith.constant 1.000000e+00 : f32
    %18 = vector.broadcast %cst_19 : f32 to vector<2x96xf32>
    %19 = arith.addf %18, %17 : vector<2x96xf32>
    %20 = arith.divf %18, %19 : vector<2x96xf32>
    %21 = vector.extract_strided_slice %14 {offsets = [0, 96], sizes = [2, 32], strides = [1, 1]} : vector<2x128xf32> to vector<2x32xf32>
    %22 = math.tanh %21 : vector<2x32xf32>
    %23 = vector.extract_strided_slice %20 {offsets = [0, 0], sizes = [2, 32], strides = [1, 1]} : vector<2x96xf32> to vector<2x32xf32>
    %24 = vector.extract_strided_slice %20 {offsets = [0, 32], sizes = [2, 32], strides = [1, 1]} : vector<2x96xf32> to vector<2x32xf32>
    %25 = vector.extract_strided_slice %20 {offsets = [0, 64], sizes = [2, 32], strides = [1, 1]} : vector<2x96xf32> to vector<2x32xf32>
    %26 = arith.mulf %24, %7 : vector<2x32xf32>
    %27 = arith.mulf %23, %22 : vector<2x32xf32>
    %28 = arith.addf %26, %27 : vector<2x32xf32>
    %29 = math.tanh %28 : vector<2x32xf32>
    %30 = arith.mulf %25, %29 : vector<2x32xf32>
    %cst_20 = arith.constant dense<0.000000e+00> : vector<2x128xf32>
    %31 = tpu.matmul %30, %1, %cst_20 {dimension_numbers = #tpu.dot_dimension_numbers<[1], [0], [0], [1], [0, 0, 1, 1], [], []>} : vector<2x32xf32>, vector<32x128xf32>, vector<2x128xf32> -> vector<2x128xf32>
    %32 = arith.addf %31, %10 : vector<2x128xf32>
    %33 = arith.addf %32, %5 : vector<2x128xf32>
    %34 = vector.extract_strided_slice %33 {offsets = [0, 0], sizes = [2, 96], strides = [1, 1]} : vector<2x128xf32> to vector<2x96xf32>
    %35 = arith.negf %34 : vector<2x96xf32>
    %36 = math.exp %35 : vector<2x96xf32>
    %cst_21 = arith.constant 1.000000e+00 : f32
    %37 = vector.broadcast %cst_21 : f32 to vector<2x96xf32>
    %38 = arith.addf %37, %36 : vector<2x96xf32>
    %39 = arith.divf %37, %38 : vector<2x96xf32>
    %40 = vector.extract_strided_slice %33 {offsets = [0, 96], sizes = [2, 32], strides = [1, 1]} : vector<2x128xf32> to vector<2x32xf32>
    %41 = math.tanh %40 : vector<2x32xf32>
    %42 = vector.extract_strided_slice %39 {offsets = [0, 0], sizes = [2, 32], strides = [1, 1]} : vector<2x96xf32> to vector<2x32xf32>
    %43 = vector.extract_strided_slice %39 {offsets = [0, 32], sizes = [2, 32], strides = [1, 1]} : vector<2x96xf32> to vector<2x32xf32>
    %44 = vector.extract_strided_slice %39 {offsets = [0, 64], sizes = [2, 32], strides = [1, 1]} : vector<2x96xf32> to vector<2x32xf32>
    %45 = arith.mulf %43, %9 : vector<2x32xf32>
    %46 = arith.mulf %42, %41 : vector<2x32xf32>
    %47 = arith.addf %45, %46 : vector<2x32xf32>
    %48 = math.tanh %47 : vector<2x32xf32>
    %49 = arith.mulf %44, %48 : vector<2x32xf32>
    %cst_22 = arith.constant dense<0.000000e+00> : vector<2x128xf32>
    %50 = tpu.matmul %49, %2, %cst_22 {dimension_numbers = #tpu.dot_dimension_numbers<[1], [0], [0], [1], [0, 0, 1, 1], [], []>} : vector<2x32xf32>, vector<32x128xf32>, vector<2x128xf32> -> vector<2x128xf32>
    %c1 = arith.constant 1 : index
    %c0_23 = arith.constant 0 : index
    %c0_24 = arith.constant 0 : index
    %51 = vector.load %arg1[%c1, %c0_23, %c0_24] : memref<8x2x128xf32, #tpu.memory_space<vmem>>, vector<1x2x128xf32>
    %52 = vector.shape_cast %51 : vector<1x2x128xf32> to vector<2x128xf32>
    %cst_25 = arith.constant dense<0.000000e+00> : vector<2x128xf32>
    %53 = tpu.matmul %30, %0, %cst_25 {dimension_numbers = #tpu.dot_dimension_numbers<[1], [0], [0], [1], [0, 0, 1, 1], [], []>} : vector<2x32xf32>, vector<32x128xf32>, vector<2x128xf32> -> vector<2x128xf32>
    %54 = arith.addf %52, %53 : vector<2x128xf32>
    %55 = vector.extract_strided_slice %54 {offsets = [0, 0], sizes = [2, 96], strides = [1, 1]} : vector<2x128xf32> to vector<2x96xf32>
    %56 = arith.negf %55 : vector<2x96xf32>
    %57 = math.exp %56 : vector<2x96xf32>
    %cst_26 = arith.constant 1.000000e+00 : f32
    %58 = vector.broadcast %cst_26 : f32 to vector<2x96xf32>
    %59 = arith.addf %58, %57 : vector<2x96xf32>
    %60 = arith.divf %58, %59 : vector<2x96xf32>
    %61 = vector.extract_strided_slice %54 {offsets = [0, 96], sizes = [2, 32], strides = [1, 1]} : vector<2x128xf32> to vector<2x32xf32>
    %62 = math.tanh %61 : vector<2x32xf32>
    %63 = vector.extract_strided_slice %60 {offsets = [0, 0], sizes = [2, 32], strides = [1, 1]} : vector<2x96xf32> to vector<2x32xf32>
    %64 = vector.extract_strided_slice %60 {offsets = [0, 32], sizes = [2, 32], strides = [1, 1]} : vector<2x96xf32> to vector<2x32xf32>
    %65 = vector.extract_strided_slice %60 {offsets = [0, 64], sizes = [2, 32], strides = [1, 1]} : vector<2x96xf32> to vector<2x32xf32>
    %66 = arith.mulf %64, %28 : vector<2x32xf32>
    %67 = arith.mulf %63, %62 : vector<2x32xf32>
    %68 = arith.addf %66, %67 : vector<2x32xf32>
    %69 = math.tanh %68 : vector<2x32xf32>
    %70 = arith.mulf %65, %69 : vector<2x32xf32>
    %cst_27 = arith.constant dense<0.000000e+00> : vector<2x128xf32>
    %71 = tpu.matmul %70, %1, %cst_27 {dimension_numbers = #tpu.dot_dimension_numbers<[1], [0], [0], [1], [0, 0, 1, 1], [], []>} : vector<2x32xf32>, vector<32x128xf32>, vector<2x128xf32> -> vector<2x128xf32>
    %72 = arith.addf %71, %50 : vector<2x128xf32>
    %73 = arith.addf %72, %5 : vector<2x128xf32>
    %74 = vector.extract_strided_slice %73 {offsets = [0, 0], sizes = [2, 96], strides = [1, 1]} : vector<2x128xf32> to vector<2x96xf32>
    %75 = arith.negf %74 : vector<2x96xf32>
    %76 = math.exp %75 : vector<2x96xf32>
    %cst_28 = arith.constant 1.000000e+00 : f32
    %77 = vector.broadcast %cst_28 : f32 to vector<2x96xf32>
    %78 = arith.addf %77, %76 : vector<2x96xf32>
    %79 = arith.divf %77, %78 : vector<2x96xf32>
    %80 = vector.extract_strided_slice %73 {offsets = [0, 96], sizes = [2, 32], strides = [1, 1]} : vector<2x128xf32> to vector<2x32xf32>
    %81 = math.tanh %80 : vector<2x32xf32>
    %82 = vector.extract_strided_slice %79 {offsets = [0, 0], sizes = [2, 32], strides = [1, 1]} : vector<2x96xf32> to vector<2x32xf32>
    %83 = vector.extract_strided_slice %79 {offsets = [0, 32], sizes = [2, 32], strides = [1, 1]} : vector<2x96xf32> to vector<2x32xf32>
    %84 = vector.extract_strided_slice %79 {offsets = [0, 64], sizes = [2, 32], strides = [1, 1]} : vector<2x96xf32> to vector<2x32xf32>
    %85 = arith.mulf %83, %47 : vector<2x32xf32>
    %86 = arith.mulf %82, %81 : vector<2x32xf32>
    %87 = arith.addf %85, %86 : vector<2x32xf32>
    %88 = math.tanh %87 : vector<2x32xf32>
    %89 = arith.mulf %84, %88 : vector<2x32xf32>
    %cst_29 = arith.constant dense<0.000000e+00> : vector<2x128xf32>
    %90 = tpu.matmul %89, %2, %cst_29 {dimension_numbers = #tpu.dot_dimension_numbers<[1], [0], [0], [1], [0, 0, 1, 1], [], []>} : vector<2x32xf32>, vector<32x128xf32>, vector<2x128xf32> -> vector<2x128xf32>
    %c2 = arith.constant 2 : index
    %c0_30 = arith.constant 0 : index
    %c0_31 = arith.constant 0 : index
    %91 = vector.load %arg1[%c2, %c0_30, %c0_31] : memref<8x2x128xf32, #tpu.memory_space<vmem>>, vector<1x2x128xf32>
    %92 = vector.shape_cast %91 : vector<1x2x128xf32> to vector<2x128xf32>
    %cst_32 = arith.constant dense<0.000000e+00> : vector<2x128xf32>
    %93 = tpu.matmul %70, %0, %cst_32 {dimension_numbers = #tpu.dot_dimension_numbers<[1], [0], [0], [1], [0, 0, 1, 1], [], []>} : vector<2x32xf32>, vector<32x128xf32>, vector<2x128xf32> -> vector<2x128xf32>
    %94 = arith.addf %92, %93 : vector<2x128xf32>
    %95 = vector.extract_strided_slice %94 {offsets = [0, 0], sizes = [2, 96], strides = [1, 1]} : vector<2x128xf32> to vector<2x96xf32>
    %96 = arith.negf %95 : vector<2x96xf32>
    %97 = math.exp %96 : vector<2x96xf32>
    %cst_33 = arith.constant 1.000000e+00 : f32
    %98 = vector.broadcast %cst_33 : f32 to vector<2x96xf32>
    %99 = arith.addf %98, %97 : vector<2x96xf32>
    %100 = arith.divf %98, %99 : vector<2x96xf32>
    %101 = vector.extract_strided_slice %94 {offsets = [0, 96], sizes = [2, 32], strides = [1, 1]} : vector<2x128xf32> to vector<2x32xf32>
    %102 = math.tanh %101 : vector<2x32xf32>
    %103 = vector.extract_strided_slice %100 {offsets = [0, 0], sizes = [2, 32], strides = [1, 1]} : vector<2x96xf32> to vector<2x32xf32>
    %104 = vector.extract_strided_slice %100 {offsets = [0, 32], sizes = [2, 32], strides = [1, 1]} : vector<2x96xf32> to vector<2x32xf32>
    %105 = vector.extract_strided_slice %100 {offsets = [0, 64], sizes = [2, 32], strides = [1, 1]} : vector<2x96xf32> to vector<2x32xf32>
    %106 = arith.mulf %104, %68 : vector<2x32xf32>
    %107 = arith.mulf %103, %102 : vector<2x32xf32>
    %108 = arith.addf %106, %107 : vector<2x32xf32>
    %109 = math.tanh %108 : vector<2x32xf32>
    %110 = arith.mulf %105, %109 : vector<2x32xf32>
    %cst_34 = arith.constant dense<0.000000e+00> : vector<2x128xf32>
    %111 = tpu.matmul %110, %1, %cst_34 {dimension_numbers = #tpu.dot_dimension_numbers<[1], [0], [0], [1], [0, 0, 1, 1], [], []>} : vector<2x32xf32>, vector<32x128xf32>, vector<2x128xf32> -> vector<2x128xf32>
    %112 = arith.addf %111, %90 : vector<2x128xf32>
    %113 = arith.addf %112, %5 : vector<2x128xf32>
    %114 = vector.extract_strided_slice %113 {offsets = [0, 0], sizes = [2, 96], strides = [1, 1]} : vector<2x128xf32> to vector<2x96xf32>
    %115 = arith.negf %114 : vector<2x96xf32>
    %116 = math.exp %115 : vector<2x96xf32>
    %cst_35 = arith.constant 1.000000e+00 : f32
    %117 = vector.broadcast %cst_35 : f32 to vector<2x96xf32>
    %118 = arith.addf %117, %116 : vector<2x96xf32>
    %119 = arith.divf %117, %118 : vector<2x96xf32>
    %120 = vector.extract_strided_slice %113 {offsets = [0, 96], sizes = [2, 32], strides = [1, 1]} : vector<2x128xf32> to vector<2x32xf32>
    %121 = math.tanh %120 : vector<2x32xf32>
    %122 = vector.extract_strided_slice %119 {offsets = [0, 0], sizes = [2, 32], strides = [1, 1]} : vector<2x96xf32> to vector<2x32xf32>
    %123 = vector.extract_strided_slice %119 {offsets = [0, 32], sizes = [2, 32], strides = [1, 1]} : vector<2x96xf32> to vector<2x32xf32>
    %124 = vector.extract_strided_slice %119 {offsets = [0, 64], sizes = [2, 32], strides = [1, 1]} : vector<2x96xf32> to vector<2x32xf32>
    %125 = arith.mulf %123, %87 : vector<2x32xf32>
    %126 = arith.mulf %122, %121 : vector<2x32xf32>
    %127 = arith.addf %125, %126 : vector<2x32xf32>
    %128 = math.tanh %127 : vector<2x32xf32>
    %129 = arith.mulf %124, %128 : vector<2x32xf32>
    %cst_36 = arith.constant dense<0.000000e+00> : vector<2x128xf32>
    %130 = tpu.matmul %129, %2, %cst_36 {dimension_numbers = #tpu.dot_dimension_numbers<[1], [0], [0], [1], [0, 0, 1, 1], [], []>} : vector<2x32xf32>, vector<32x128xf32>, vector<2x128xf32> -> vector<2x128xf32>
    %c3 = arith.constant 3 : index
    %c0_37 = arith.constant 0 : index
    %c0_38 = arith.constant 0 : index
    %131 = vector.load %arg1[%c3, %c0_37, %c0_38] : memref<8x2x128xf32, #tpu.memory_space<vmem>>, vector<1x2x128xf32>
    %132 = vector.shape_cast %131 : vector<1x2x128xf32> to vector<2x128xf32>
    %cst_39 = arith.constant dense<0.000000e+00> : vector<2x128xf32>
    %133 = tpu.matmul %110, %0, %cst_39 {dimension_numbers = #tpu.dot_dimension_numbers<[1], [0], [0], [1], [0, 0, 1, 1], [], []>} : vector<2x32xf32>, vector<32x128xf32>, vector<2x128xf32> -> vector<2x128xf32>
    %134 = arith.addf %132, %133 : vector<2x128xf32>
    %135 = vector.extract_strided_slice %134 {offsets = [0, 0], sizes = [2, 96], strides = [1, 1]} : vector<2x128xf32> to vector<2x96xf32>
    %136 = arith.negf %135 : vector<2x96xf32>
    %137 = math.exp %136 : vector<2x96xf32>
    %cst_40 = arith.constant 1.000000e+00 : f32
    %138 = vector.broadcast %cst_40 : f32 to vector<2x96xf32>
    %139 = arith.addf %138, %137 : vector<2x96xf32>
    %140 = arith.divf %138, %139 : vector<2x96xf32>
    %141 = vector.extract_strided_slice %134 {offsets = [0, 96], sizes = [2, 32], strides = [1, 1]} : vector<2x128xf32> to vector<2x32xf32>
    %142 = math.tanh %141 : vector<2x32xf32>
    %143 = vector.extract_strided_slice %140 {offsets = [0, 0], sizes = [2, 32], strides = [1, 1]} : vector<2x96xf32> to vector<2x32xf32>
    %144 = vector.extract_strided_slice %140 {offsets = [0, 32], sizes = [2, 32], strides = [1, 1]} : vector<2x96xf32> to vector<2x32xf32>
    %145 = vector.extract_strided_slice %140 {offsets = [0, 64], sizes = [2, 32], strides = [1, 1]} : vector<2x96xf32> to vector<2x32xf32>
    %146 = arith.mulf %144, %108 : vector<2x32xf32>
    %147 = arith.mulf %143, %142 : vector<2x32xf32>
    %148 = arith.addf %146, %147 : vector<2x32xf32>
    %149 = math.tanh %148 : vector<2x32xf32>
    %150 = arith.mulf %145, %149 : vector<2x32xf32>
    %cst_41 = arith.constant dense<0.000000e+00> : vector<2x128xf32>
    %151 = tpu.matmul %150, %1, %cst_41 {dimension_numbers = #tpu.dot_dimension_numbers<[1], [0], [0], [1], [0, 0, 1, 1], [], []>} : vector<2x32xf32>, vector<32x128xf32>, vector<2x128xf32> -> vector<2x128xf32>
    %152 = arith.addf %151, %130 : vector<2x128xf32>
    %153 = arith.addf %152, %5 : vector<2x128xf32>
    %154 = vector.extract_strided_slice %153 {offsets = [0, 0], sizes = [2, 96], strides = [1, 1]} : vector<2x128xf32> to vector<2x96xf32>
    %155 = arith.negf %154 : vector<2x96xf32>
    %156 = math.exp %155 : vector<2x96xf32>
    %cst_42 = arith.constant 1.000000e+00 : f32
    %157 = vector.broadcast %cst_42 : f32 to vector<2x96xf32>
    %158 = arith.addf %157, %156 : vector<2x96xf32>
    %159 = arith.divf %157, %158 : vector<2x96xf32>
    %160 = vector.extract_strided_slice %153 {offsets = [0, 96], sizes = [2, 32], strides = [1, 1]} : vector<2x128xf32> to vector<2x32xf32>
    %161 = math.tanh %160 : vector<2x32xf32>
    %162 = vector.extract_strided_slice %159 {offsets = [0, 0], sizes = [2, 32], strides = [1, 1]} : vector<2x96xf32> to vector<2x32xf32>
    %163 = vector.extract_strided_slice %159 {offsets = [0, 32], sizes = [2, 32], strides = [1, 1]} : vector<2x96xf32> to vector<2x32xf32>
    %164 = vector.extract_strided_slice %159 {offsets = [0, 64], sizes = [2, 32], strides = [1, 1]} : vector<2x96xf32> to vector<2x32xf32>
    %165 = arith.mulf %163, %127 : vector<2x32xf32>
    %166 = arith.mulf %162, %161 : vector<2x32xf32>
    %167 = arith.addf %165, %166 : vector<2x32xf32>
    %168 = math.tanh %167 : vector<2x32xf32>
    %169 = arith.mulf %164, %168 : vector<2x32xf32>
    %cst_43 = arith.constant dense<0.000000e+00> : vector<2x128xf32>
    %170 = tpu.matmul %169, %2, %cst_43 {dimension_numbers = #tpu.dot_dimension_numbers<[1], [0], [0], [1], [0, 0, 1, 1], [], []>} : vector<2x32xf32>, vector<32x128xf32>, vector<2x128xf32> -> vector<2x128xf32>
    %c4 = arith.constant 4 : index
    %c0_44 = arith.constant 0 : index
    %c0_45 = arith.constant 0 : index
    %171 = vector.load %arg1[%c4, %c0_44, %c0_45] : memref<8x2x128xf32, #tpu.memory_space<vmem>>, vector<1x2x128xf32>
    %172 = vector.shape_cast %171 : vector<1x2x128xf32> to vector<2x128xf32>
    %cst_46 = arith.constant dense<0.000000e+00> : vector<2x128xf32>
    %173 = tpu.matmul %150, %0, %cst_46 {dimension_numbers = #tpu.dot_dimension_numbers<[1], [0], [0], [1], [0, 0, 1, 1], [], []>} : vector<2x32xf32>, vector<32x128xf32>, vector<2x128xf32> -> vector<2x128xf32>
    %174 = arith.addf %172, %173 : vector<2x128xf32>
    %175 = vector.extract_strided_slice %174 {offsets = [0, 0], sizes = [2, 96], strides = [1, 1]} : vector<2x128xf32> to vector<2x96xf32>
    %176 = arith.negf %175 : vector<2x96xf32>
    %177 = math.exp %176 : vector<2x96xf32>
    %cst_47 = arith.constant 1.000000e+00 : f32
    %178 = vector.broadcast %cst_47 : f32 to vector<2x96xf32>
    %179 = arith.addf %178, %177 : vector<2x96xf32>
    %180 = arith.divf %178, %179 : vector<2x96xf32>
    %181 = vector.extract_strided_slice %174 {offsets = [0, 96], sizes = [2, 32], strides = [1, 1]} : vector<2x128xf32> to vector<2x32xf32>
    %182 = math.tanh %181 : vector<2x32xf32>
    %183 = vector.extract_strided_slice %180 {offsets = [0, 0], sizes = [2, 32], strides = [1, 1]} : vector<2x96xf32> to vector<2x32xf32>
    %184 = vector.extract_strided_slice %180 {offsets = [0, 32], sizes = [2, 32], strides = [1, 1]} : vector<2x96xf32> to vector<2x32xf32>
    %185 = vector.extract_strided_slice %180 {offsets = [0, 64], sizes = [2, 32], strides = [1, 1]} : vector<2x96xf32> to vector<2x32xf32>
    %186 = arith.mulf %184, %148 : vector<2x32xf32>
    %187 = arith.mulf %183, %182 : vector<2x32xf32>
    %188 = arith.addf %186, %187 : vector<2x32xf32>
    %189 = math.tanh %188 : vector<2x32xf32>
    %190 = arith.mulf %185, %189 : vector<2x32xf32>
    %cst_48 = arith.constant dense<0.000000e+00> : vector<2x128xf32>
    %191 = tpu.matmul %190, %1, %cst_48 {dimension_numbers = #tpu.dot_dimension_numbers<[1], [0], [0], [1], [0, 0, 1, 1], [], []>} : vector<2x32xf32>, vector<32x128xf32>, vector<2x128xf32> -> vector<2x128xf32>
    %192 = arith.addf %191, %170 : vector<2x128xf32>
    %193 = arith.addf %192, %5 : vector<2x128xf32>
    %194 = vector.extract_strided_slice %193 {offsets = [0, 0], sizes = [2, 96], strides = [1, 1]} : vector<2x128xf32> to vector<2x96xf32>
    %195 = arith.negf %194 : vector<2x96xf32>
    %196 = math.exp %195 : vector<2x96xf32>
    %cst_49 = arith.constant 1.000000e+00 : f32
    %197 = vector.broadcast %cst_49 : f32 to vector<2x96xf32>
    %198 = arith.addf %197, %196 : vector<2x96xf32>
    %199 = arith.divf %197, %198 : vector<2x96xf32>
    %200 = vector.extract_strided_slice %193 {offsets = [0, 96], sizes = [2, 32], strides = [1, 1]} : vector<2x128xf32> to vector<2x32xf32>
    %201 = math.tanh %200 : vector<2x32xf32>
    %202 = vector.extract_strided_slice %199 {offsets = [0, 0], sizes = [2, 32], strides = [1, 1]} : vector<2x96xf32> to vector<2x32xf32>
    %203 = vector.extract_strided_slice %199 {offsets = [0, 32], sizes = [2, 32], strides = [1, 1]} : vector<2x96xf32> to vector<2x32xf32>
    %204 = vector.extract_strided_slice %199 {offsets = [0, 64], sizes = [2, 32], strides = [1, 1]} : vector<2x96xf32> to vector<2x32xf32>
    %205 = arith.mulf %203, %167 : vector<2x32xf32>
    %206 = arith.mulf %202, %201 : vector<2x32xf32>
    %207 = arith.addf %205, %206 : vector<2x32xf32>
    %208 = math.tanh %207 : vector<2x32xf32>
    %209 = arith.mulf %204, %208 : vector<2x32xf32>
    %cst_50 = arith.constant dense<0.000000e+00> : vector<2x128xf32>
    %210 = tpu.matmul %209, %2, %cst_50 {dimension_numbers = #tpu.dot_dimension_numbers<[1], [0], [0], [1], [0, 0, 1, 1], [], []>} : vector<2x32xf32>, vector<32x128xf32>, vector<2x128xf32> -> vector<2x128xf32>
    %c5 = arith.constant 5 : index
    %c0_51 = arith.constant 0 : index
    %c0_52 = arith.constant 0 : index
    %211 = vector.load %arg1[%c5, %c0_51, %c0_52] : memref<8x2x128xf32, #tpu.memory_space<vmem>>, vector<1x2x128xf32>
    %212 = vector.shape_cast %211 : vector<1x2x128xf32> to vector<2x128xf32>
    %cst_53 = arith.constant dense<0.000000e+00> : vector<2x128xf32>
    %213 = tpu.matmul %190, %0, %cst_53 {dimension_numbers = #tpu.dot_dimension_numbers<[1], [0], [0], [1], [0, 0, 1, 1], [], []>} : vector<2x32xf32>, vector<32x128xf32>, vector<2x128xf32> -> vector<2x128xf32>
    %214 = arith.addf %212, %213 : vector<2x128xf32>
    %215 = vector.extract_strided_slice %214 {offsets = [0, 0], sizes = [2, 96], strides = [1, 1]} : vector<2x128xf32> to vector<2x96xf32>
    %216 = arith.negf %215 : vector<2x96xf32>
    %217 = math.exp %216 : vector<2x96xf32>
    %cst_54 = arith.constant 1.000000e+00 : f32
    %218 = vector.broadcast %cst_54 : f32 to vector<2x96xf32>
    %219 = arith.addf %218, %217 : vector<2x96xf32>
    %220 = arith.divf %218, %219 : vector<2x96xf32>
    %221 = vector.extract_strided_slice %214 {offsets = [0, 96], sizes = [2, 32], strides = [1, 1]} : vector<2x128xf32> to vector<2x32xf32>
    %222 = math.tanh %221 : vector<2x32xf32>
    %223 = vector.extract_strided_slice %220 {offsets = [0, 0], sizes = [2, 32], strides = [1, 1]} : vector<2x96xf32> to vector<2x32xf32>
    %224 = vector.extract_strided_slice %220 {offsets = [0, 32], sizes = [2, 32], strides = [1, 1]} : vector<2x96xf32> to vector<2x32xf32>
    %225 = vector.extract_strided_slice %220 {offsets = [0, 64], sizes = [2, 32], strides = [1, 1]} : vector<2x96xf32> to vector<2x32xf32>
    %226 = arith.mulf %224, %188 : vector<2x32xf32>
    %227 = arith.mulf %223, %222 : vector<2x32xf32>
    %228 = arith.addf %226, %227 : vector<2x32xf32>
    %229 = math.tanh %228 : vector<2x32xf32>
    %230 = arith.mulf %225, %229 : vector<2x32xf32>
    %cst_55 = arith.constant dense<0.000000e+00> : vector<2x128xf32>
    %231 = tpu.matmul %230, %1, %cst_55 {dimension_numbers = #tpu.dot_dimension_numbers<[1], [0], [0], [1], [0, 0, 1, 1], [], []>} : vector<2x32xf32>, vector<32x128xf32>, vector<2x128xf32> -> vector<2x128xf32>
    %232 = arith.addf %231, %210 : vector<2x128xf32>
    %233 = arith.addf %232, %5 : vector<2x128xf32>
    %234 = vector.extract_strided_slice %233 {offsets = [0, 0], sizes = [2, 96], strides = [1, 1]} : vector<2x128xf32> to vector<2x96xf32>
    %235 = arith.negf %234 : vector<2x96xf32>
    %236 = math.exp %235 : vector<2x96xf32>
    %cst_56 = arith.constant 1.000000e+00 : f32
    %237 = vector.broadcast %cst_56 : f32 to vector<2x96xf32>
    %238 = arith.addf %237, %236 : vector<2x96xf32>
    %239 = arith.divf %237, %238 : vector<2x96xf32>
    %240 = vector.extract_strided_slice %233 {offsets = [0, 96], sizes = [2, 32], strides = [1, 1]} : vector<2x128xf32> to vector<2x32xf32>
    %241 = math.tanh %240 : vector<2x32xf32>
    %242 = vector.extract_strided_slice %239 {offsets = [0, 0], sizes = [2, 32], strides = [1, 1]} : vector<2x96xf32> to vector<2x32xf32>
    %243 = vector.extract_strided_slice %239 {offsets = [0, 32], sizes = [2, 32], strides = [1, 1]} : vector<2x96xf32> to vector<2x32xf32>
    %244 = vector.extract_strided_slice %239 {offsets = [0, 64], sizes = [2, 32], strides = [1, 1]} : vector<2x96xf32> to vector<2x32xf32>
    %245 = arith.mulf %243, %207 : vector<2x32xf32>
    %246 = arith.mulf %242, %241 : vector<2x32xf32>
    %247 = arith.addf %245, %246 : vector<2x32xf32>
    %248 = math.tanh %247 : vector<2x32xf32>
    %249 = arith.mulf %244, %248 : vector<2x32xf32>
    %cst_57 = arith.constant dense<0.000000e+00> : vector<2x128xf32>
    %250 = tpu.matmul %249, %2, %cst_57 {dimension_numbers = #tpu.dot_dimension_numbers<[1], [0], [0], [1], [0, 0, 1, 1], [], []>} : vector<2x32xf32>, vector<32x128xf32>, vector<2x128xf32> -> vector<2x128xf32>
    %c6 = arith.constant 6 : index
    %c0_58 = arith.constant 0 : index
    %c0_59 = arith.constant 0 : index
    %251 = vector.load %arg1[%c6, %c0_58, %c0_59] : memref<8x2x128xf32, #tpu.memory_space<vmem>>, vector<1x2x128xf32>
    %252 = vector.shape_cast %251 : vector<1x2x128xf32> to vector<2x128xf32>
    %cst_60 = arith.constant dense<0.000000e+00> : vector<2x128xf32>
    %253 = tpu.matmul %230, %0, %cst_60 {dimension_numbers = #tpu.dot_dimension_numbers<[1], [0], [0], [1], [0, 0, 1, 1], [], []>} : vector<2x32xf32>, vector<32x128xf32>, vector<2x128xf32> -> vector<2x128xf32>
    %254 = arith.addf %252, %253 : vector<2x128xf32>
    %255 = vector.extract_strided_slice %254 {offsets = [0, 0], sizes = [2, 96], strides = [1, 1]} : vector<2x128xf32> to vector<2x96xf32>
    %256 = arith.negf %255 : vector<2x96xf32>
    %257 = math.exp %256 : vector<2x96xf32>
    %cst_61 = arith.constant 1.000000e+00 : f32
    %258 = vector.broadcast %cst_61 : f32 to vector<2x96xf32>
    %259 = arith.addf %258, %257 : vector<2x96xf32>
    %260 = arith.divf %258, %259 : vector<2x96xf32>
    %261 = vector.extract_strided_slice %254 {offsets = [0, 96], sizes = [2, 32], strides = [1, 1]} : vector<2x128xf32> to vector<2x32xf32>
    %262 = math.tanh %261 : vector<2x32xf32>
    %263 = vector.extract_strided_slice %260 {offsets = [0, 0], sizes = [2, 32], strides = [1, 1]} : vector<2x96xf32> to vector<2x32xf32>
    %264 = vector.extract_strided_slice %260 {offsets = [0, 32], sizes = [2, 32], strides = [1, 1]} : vector<2x96xf32> to vector<2x32xf32>
    %265 = vector.extract_strided_slice %260 {offsets = [0, 64], sizes = [2, 32], strides = [1, 1]} : vector<2x96xf32> to vector<2x32xf32>
    %266 = arith.mulf %264, %228 : vector<2x32xf32>
    %267 = arith.mulf %263, %262 : vector<2x32xf32>
    %268 = arith.addf %266, %267 : vector<2x32xf32>
    %269 = math.tanh %268 : vector<2x32xf32>
    %270 = arith.mulf %265, %269 : vector<2x32xf32>
    %cst_62 = arith.constant dense<0.000000e+00> : vector<2x128xf32>
    %271 = tpu.matmul %270, %1, %cst_62 {dimension_numbers = #tpu.dot_dimension_numbers<[1], [0], [0], [1], [0, 0, 1, 1], [], []>} : vector<2x32xf32>, vector<32x128xf32>, vector<2x128xf32> -> vector<2x128xf32>
    %272 = arith.addf %271, %250 : vector<2x128xf32>
    %273 = arith.addf %272, %5 : vector<2x128xf32>
    %274 = vector.extract_strided_slice %273 {offsets = [0, 0], sizes = [2, 96], strides = [1, 1]} : vector<2x128xf32> to vector<2x96xf32>
    %275 = arith.negf %274 : vector<2x96xf32>
    %276 = math.exp %275 : vector<2x96xf32>
    %cst_63 = arith.constant 1.000000e+00 : f32
    %277 = vector.broadcast %cst_63 : f32 to vector<2x96xf32>
    %278 = arith.addf %277, %276 : vector<2x96xf32>
    %279 = arith.divf %277, %278 : vector<2x96xf32>
    %280 = vector.extract_strided_slice %273 {offsets = [0, 96], sizes = [2, 32], strides = [1, 1]} : vector<2x128xf32> to vector<2x32xf32>
    %281 = math.tanh %280 : vector<2x32xf32>
    %282 = vector.extract_strided_slice %279 {offsets = [0, 0], sizes = [2, 32], strides = [1, 1]} : vector<2x96xf32> to vector<2x32xf32>
    %283 = vector.extract_strided_slice %279 {offsets = [0, 32], sizes = [2, 32], strides = [1, 1]} : vector<2x96xf32> to vector<2x32xf32>
    %284 = vector.extract_strided_slice %279 {offsets = [0, 64], sizes = [2, 32], strides = [1, 1]} : vector<2x96xf32> to vector<2x32xf32>
    %285 = arith.mulf %283, %247 : vector<2x32xf32>
    %286 = arith.mulf %282, %281 : vector<2x32xf32>
    %287 = arith.addf %285, %286 : vector<2x32xf32>
    %288 = math.tanh %287 : vector<2x32xf32>
    %289 = arith.mulf %284, %288 : vector<2x32xf32>
    %cst_64 = arith.constant dense<0.000000e+00> : vector<2x128xf32>
    %290 = tpu.matmul %289, %2, %cst_64 {dimension_numbers = #tpu.dot_dimension_numbers<[1], [0], [0], [1], [0, 0, 1, 1], [], []>} : vector<2x32xf32>, vector<32x128xf32>, vector<2x128xf32> -> vector<2x128xf32>
    %c7 = arith.constant 7 : index
    %c0_65 = arith.constant 0 : index
    %c0_66 = arith.constant 0 : index
    %291 = vector.load %arg1[%c7, %c0_65, %c0_66] : memref<8x2x128xf32, #tpu.memory_space<vmem>>, vector<1x2x128xf32>
    %292 = vector.shape_cast %291 : vector<1x2x128xf32> to vector<2x128xf32>
    %cst_67 = arith.constant dense<0.000000e+00> : vector<2x128xf32>
    %293 = tpu.matmul %270, %0, %cst_67 {dimension_numbers = #tpu.dot_dimension_numbers<[1], [0], [0], [1], [0, 0, 1, 1], [], []>} : vector<2x32xf32>, vector<32x128xf32>, vector<2x128xf32> -> vector<2x128xf32>
    %294 = arith.addf %292, %293 : vector<2x128xf32>
    %295 = vector.extract_strided_slice %294 {offsets = [0, 0], sizes = [2, 96], strides = [1, 1]} : vector<2x128xf32> to vector<2x96xf32>
    %296 = arith.negf %295 : vector<2x96xf32>
    %297 = math.exp %296 : vector<2x96xf32>
    %cst_68 = arith.constant 1.000000e+00 : f32
    %298 = vector.broadcast %cst_68 : f32 to vector<2x96xf32>
    %299 = arith.addf %298, %297 : vector<2x96xf32>
    %300 = arith.divf %298, %299 : vector<2x96xf32>
    %301 = vector.extract_strided_slice %294 {offsets = [0, 96], sizes = [2, 32], strides = [1, 1]} : vector<2x128xf32> to vector<2x32xf32>
    %302 = math.tanh %301 : vector<2x32xf32>
    %303 = vector.extract_strided_slice %300 {offsets = [0, 0], sizes = [2, 32], strides = [1, 1]} : vector<2x96xf32> to vector<2x32xf32>
    %304 = vector.extract_strided_slice %300 {offsets = [0, 32], sizes = [2, 32], strides = [1, 1]} : vector<2x96xf32> to vector<2x32xf32>
    %305 = vector.extract_strided_slice %300 {offsets = [0, 64], sizes = [2, 32], strides = [1, 1]} : vector<2x96xf32> to vector<2x32xf32>
    %306 = arith.mulf %304, %268 : vector<2x32xf32>
    %307 = arith.mulf %303, %302 : vector<2x32xf32>
    %308 = arith.addf %306, %307 : vector<2x32xf32>
    %309 = math.tanh %308 : vector<2x32xf32>
    %310 = arith.mulf %305, %309 : vector<2x32xf32>
    %cst_69 = arith.constant dense<0.000000e+00> : vector<2x128xf32>
    %311 = tpu.matmul %310, %1, %cst_69 {dimension_numbers = #tpu.dot_dimension_numbers<[1], [0], [0], [1], [0, 0, 1, 1], [], []>} : vector<2x32xf32>, vector<32x128xf32>, vector<2x128xf32> -> vector<2x128xf32>
    %312 = arith.addf %311, %290 : vector<2x128xf32>
    %313 = arith.addf %312, %5 : vector<2x128xf32>
    %314 = vector.extract_strided_slice %313 {offsets = [0, 0], sizes = [2, 96], strides = [1, 1]} : vector<2x128xf32> to vector<2x96xf32>
    %315 = arith.negf %314 : vector<2x96xf32>
    %316 = math.exp %315 : vector<2x96xf32>
    %cst_70 = arith.constant 1.000000e+00 : f32
    %317 = vector.broadcast %cst_70 : f32 to vector<2x96xf32>
    %318 = arith.addf %317, %316 : vector<2x96xf32>
    %319 = arith.divf %317, %318 : vector<2x96xf32>
    %320 = vector.extract_strided_slice %313 {offsets = [0, 96], sizes = [2, 32], strides = [1, 1]} : vector<2x128xf32> to vector<2x32xf32>
    %321 = math.tanh %320 : vector<2x32xf32>
    %322 = vector.extract_strided_slice %319 {offsets = [0, 0], sizes = [2, 32], strides = [1, 1]} : vector<2x96xf32> to vector<2x32xf32>
    %323 = vector.extract_strided_slice %319 {offsets = [0, 32], sizes = [2, 32], strides = [1, 1]} : vector<2x96xf32> to vector<2x32xf32>
    %324 = vector.extract_strided_slice %319 {offsets = [0, 64], sizes = [2, 32], strides = [1, 1]} : vector<2x96xf32> to vector<2x32xf32>
    %325 = arith.mulf %323, %287 : vector<2x32xf32>
    %326 = arith.mulf %322, %321 : vector<2x32xf32>
    %327 = arith.addf %325, %326 : vector<2x32xf32>
    %328 = math.tanh %327 : vector<2x32xf32>
    %329 = arith.mulf %324, %328 : vector<2x32xf32>
    %c0_71 = arith.constant 0 : index
    %c0_72 = arith.constant 0 : index
    %330 = vector.load %arg10[%c0_71, %c0_72] : memref<32x128xf32, #tpu.memory_space<vmem>>, vector<32x128xf32>
    %cst_73 = arith.constant dense<0.000000e+00> : vector<2x128xf32>
    %331 = tpu.matmul %329, %330, %cst_73 {dimension_numbers = #tpu.dot_dimension_numbers<[1], [0], [0], [1], [0, 0, 1, 1], [], []>} : vector<2x32xf32>, vector<32x128xf32>, vector<2x128xf32> -> vector<2x128xf32>
    %c0_74 = arith.constant 0 : index
    %c0_75 = arith.constant 0 : index
    %332 = vector.load %arg11[%c0_74, %c0_75] : memref<1x128xf32, #tpu.memory_space<vmem>>, vector<1x128xf32>
    %333 = vector.broadcast %332 : vector<1x128xf32> to vector<2x128xf32>
    %334 = arith.addf %331, %333 : vector<2x128xf32>
    %c0_76 = arith.constant 0 : index
    %c0_77 = arith.constant 0 : index
    %335 = vector.load %arg12[%c0_76, %c0_77] : memref<2x128xf32, #tpu.memory_space<vmem>>, vector<2x128xf32>
    tpu.vector_store %arg12[%c0_76, %c0_77], %334 {strides = array<i32>} : memref<2x128xf32, #tpu.memory_space<vmem>>, vector<2x128xf32>,
    return
  }
  func.func @transform_0(%arg0: i32) -> (i32, i32, i32) {
    %c0_i32 = arith.constant 0 : i32
    %c0_i32_0 = arith.constant 0 : i32
    %c0_i32_1 = arith.constant 0 : i32
    %c0_i32_2 = arith.constant 0 : i32
    return %c0_i32, %c0_i32_0, %c0_i32_1 : i32, i32, i32
  }
  func.func @transform_1(%arg0: i32) -> (i32, i32) {
    %c0_i32 = arith.constant 0 : i32
    %c0_i32_0 = arith.constant 0 : i32
    %c0_i32_1 = arith.constant 0 : i32
    return %c0_i32, %c0_i32_0 : i32, i32
  }
  func.func @transform_2(%arg0: i32) -> (i32, i32) {
    %c0_i32 = arith.constant 0 : i32
    %c0_i32_0 = arith.constant 0 : i32
    %c0_i32_1 = arith.constant 0 : i32
    return %c0_i32, %c0_i32_0 : i32, i32
  }
  func.func @transform_3(%arg0: i32) -> (i32, i32) {
    %c0_i32 = arith.constant 0 : i32
    %c0_i32_0 = arith.constant 0 : i32
    %c0_i32_1 = arith.constant 0 : i32
    return %c0_i32, %c0_i32_0 : i32, i32
  }
  func.func @transform_4(%arg0: i32) -> (i32, i32) {
    %c0_i32 = arith.constant 0 : i32
    %c0_i32_0 = arith.constant 0 : i32
    %c0_i32_1 = arith.constant 0 : i32
    return %c0_i32, %c0_i32_0 : i32, i32
  }
  func.func @transform_5(%arg0: i32) -> (i32, i32) {
    %c0_i32 = arith.constant 0 : i32
    %c0_i32_0 = arith.constant 0 : i32
    %c0_i32_1 = arith.constant 0 : i32
    return %c0_i32, %c0_i32_0 : i32, i32
  }
  func.func @transform_6(%arg0: i32) -> (i32, i32) {
    %c0_i32 = arith.constant 0 : i32
    %c0_i32_0 = arith.constant 0 : i32
    %c0_i32_1 = arith.constant 0 : i32
    return %c0_i32, %c0_i32_0 : i32, i32
  }
  func.func @transform_7(%arg0: i32) -> (i32, i32) {
    %c0_i32 = arith.constant 0 : i32
    %c0_i32_0 = arith.constant 0 : i32
    %c0_i32_1 = arith.constant 0 : i32
    return %c0_i32, %c0_i32_0 : i32, i32
  }
  func.func @transform_8(%arg0: i32) -> (i32, i32) {
    %c0_i32 = arith.constant 0 : i32
    %c0_i32_0 = arith.constant 0 : i32
    %c0_i32_1 = arith.constant 0 : i32
    return %c0_i32, %c0_i32_0 : i32, i32
  }
  func.func @transform_9(%arg0: i32) -> (i32, i32) {
    %c0_i32 = arith.constant 0 : i32
    %c0_i32_0 = arith.constant 0 : i32
    %c0_i32_1 = arith.constant 0 : i32
    return %c0_i32, %c0_i32_0 : i32, i32
  }
  func.func @transform_10(%arg0: i32) -> (i32, i32) {
    %c0_i32 = arith.constant 0 : i32
    %c0_i32_0 = arith.constant 0 : i32
    %c0_i32_1 = arith.constant 0 : i32
    return %c0_i32, %c0_i32_0 : i32, i32
  }
  func.func @transform_11(%arg0: i32) -> (i32, i32) {
    %c0_i32 = arith.constant 0 : i32
    %c0_i32_0 = arith.constant 0 : i32
    %c0_i32_1 = arith.constant 0 : i32
    return %c0_i32, %c0_i32_0 : i32, i32
  }
}

</mosaic_0001>

<bundles_post_ra>
// kernel: stacked_rnn_forward.1
= control target key start
LH: loop header
LB: loop body
LE: loop exit
PB: predicated region body
PF: predicated region fallthrough
CT: control target
= control target key end

     0   :  { %16 = vsyncpa [#allocation3], 0  ;;  %s3784_s0 = inlined_call_operand.vmem [shape: f32[8,2,128], index: 0, kind: input, shape index: {}]   ;;  %s3785_s1 = inlined_call_operand.hbm [shape: f32[2,32], index: 1, kind: input, shape index: {}]   ;;  %s3786_s2 = inlined_call_operand.hbm [shape: f32[2,32], index: 2, kind: input, shape index: {}]   ;;  %s3787_s3 = inlined_call_operand.hbm [shape: f32[2,32], index: 3, kind: input, shape index: {}]   ;;  %s3788_s4 = inlined_call_operand.hbm [shape: f32[2,32], index: 4, kind: input, shape index: {}]   ;;  %s3789_s5 = inlined_call_operand.vmem [shape: f32[32,128], index: 5, kind: input, shape index: {}]   ;;  %s3790_s6 = inlined_call_operand.vmem [shape: f32[32,128], index: 6, kind: input, shape index: {}]   ;;  %s3791_s7 = inlined_call_operand.vmem [shape: f32[32,128], index: 7, kind: input, shape index: {}]   ;;  %s3792_s8 = inlined_call_operand.hbm [shape: f32[1,128], index: 8, kind: input, shape index: {}]   ;;  %s3793_s9 = inlined_call_operand.vmem [shape: f32[32,128], index: 9, kind: input, shape index: {}]   ;;  %s3794_s10 = inlined_call_operand.hbm [shape: f32[1,128], index: 10, kind: input, shape index: {}]   ;;  %s3795_s11 = inlined_call_operand.hbm [shape: f32[2,128], index: 11, kind: output, shape index: {}]  }
   0x1   :  { %17 = vsyncpa [#allocation6], 0 }
   0x2   :  { %18 = vsyncpa [#allocation9], 0 }
   0x3   :  { %19 = vsyncpa [#allocation12], 0 }
   0x4   :  { %20 = vsyncpa [#allocation4], 0  ;;  %s3170_s17 = smov [#allocation5]   ;;  %s3171_s19 = smov [#allocation8]  }
   0x5   :  { %s39_s18 = sshll.u32 %s3170_s17, 4  ;;  %s59_s20 = sshll.u32 %s3171_s19, 4  ;;  %s40_s18 = int_to_ptr.vmem [resolvable:$true] %s39_s18  ;;  %s60_s20 = int_to_ptr.vmem [resolvable:$true] %s59_s20 }
   0x6   :  { %s3028_s21 = scalar_lea.vmem %s40_s18, 32  ;;  %p3033_p1 = scmp.lt.s32.totalorder %s40_s18, %s40_s18 }
   0x7   :  { %p3029_p0 = scmp.ne.s32.totalorder %s40_s18, %s3028_s21  ;;  %p3034_p2 = scmp.lt.s32.totalorder %s3028_s21, %s3028_s21 }
   0x9   :  { %p3035_p3 = por %p3034_p2, %p3033_p1 }
   0xb   :  { %p3036_p4 = pnand %p3035_p3, %p3029_p0 }
   0xd   :  { %3039 = shalt.err (!%p3036_p4)
}
   0xe   :  { %42 = dma.hbm_to_vmem [thread:$0]  %s3786_s2, 32, %s40_s18, [#allocation6]  }
   0xf   :  { %s3048_s24 = scalar_lea.vmem %s60_s20, 32  ;;  %p3053_p6 = scmp.lt.s32.totalorder %s60_s20, %s60_s20 }
  0x10   :  { %p3049_p5 = scmp.ne.s32.totalorder %s60_s20, %s3048_s24  ;;  %p3054_p7 = scmp.lt.s32.totalorder %s3048_s24, %s3048_s24 }
  0x12   :  { %p3055_p8 = por %p3054_p7, %p3053_p6 }
  0x14   :  { %p3056_p9 = pnand %p3055_p8, %p3049_p5 }
  0x16   :  { %3059 = shalt.err (!%p3056_p9)
}
  0x17   :  { %62 = dma.hbm_to_vmem [thread:$0]  %s3788_s4, 32, %s60_s20, [#allocation9]  }
  0x18   :  { %s3172_s27 = smov [#allocation2]   ;;  %s3173_s29 = smov [#allocation7]  }
  0x19   :  { %s29_s28 = sshll.u32 %s3172_s27, 4  ;;  %s49_s30 = sshll.u32 %s3173_s29, 4  ;;  %s30_s28 = int_to_ptr.vmem [resolvable:$true] %s29_s28  ;;  %s50_s30 = int_to_ptr.vmem [resolvable:$true] %s49_s30 }
  0x1a   :  { %s3068_s12 = scalar_lea.vmem %s30_s28, 32  ;;  %p3073_p11 = scmp.lt.s32.totalorder %s30_s28, %s30_s28 }
  0x1b   :  { %p3069_p10 = scmp.ne.s32.totalorder %s30_s28, %s3068_s12  ;;  %p3074_p12 = scmp.lt.s32.totalorder %s3068_s12, %s3068_s12 }
  0x1d   :  { %p3075_p13 = por %p3074_p12, %p3073_p11 }
  0x1f   :  { %p3076_p0 = pnand %p3075_p13, %p3069_p10 }
  0x21   :  { %3079 = shalt.err (!%p3076_p0)
}
  0x22   :  { %32 = dma.hbm_to_vmem [thread:$0]  %s3785_s1, 32, %s30_s28, [#allocation3]  }
  0x23   :  { %s3088_s14 = scalar_lea.vmem %s50_s30, 32  ;;  %p3093_p2 = scmp.lt.s32.totalorder %s50_s30, %s50_s30 }
  0x24   :  { %p3089_p1 = scmp.ne.s32.totalorder %s50_s30, %s3088_s14  ;;  %p3094_p3 = scmp.lt.s32.totalorder %s3088_s14, %s3088_s14 }
  0x26   :  { %p3095_p4 = por %p3094_p3, %p3093_p2 }
  0x28   :  { %p3096_p5 = pnand %p3095_p4, %p3089_p1 }
  0x2a   :  { %3099 = shalt.err (!%p3096_p5)
}
  0x2b   :  { %52 = dma.hbm_to_vmem [thread:$0]  %s3787_s3, 32, %s50_s30, [#allocation6]  }
  0x2c   :  { %s3174_s16 = smov [#allocation10]   ;;  %s3175_s18 = smov [#allocation11]  }
  0x2d   :  { %s75_s17 = sshll.u32 %s3174_s16, 4  ;;  %s87_s19 = sshll.u32 %s3175_s18, 4  ;;  %s76_s17 = int_to_ptr.vmem [resolvable:$true] %s75_s17  ;;  %s88_s19 = int_to_ptr.vmem [resolvable:$true] %s87_s19 }
  0x2e   :  { %s3108_s20 = scalar_lea.vmem %s76_s17, 16  ;;  %s3112_s1 = scalar_lea.vmem %s76_s17, 32 }
  0x2f   :  { %p3109_p6 = scmp.ne.s32.totalorder %s76_s17, %s3108_s20  ;;  %p3113_p7 = scmp.lt.s32.totalorder %s76_s17, %s76_s17 }
  0x30   :  { %p3114_p8 = scmp.lt.s32.totalorder %s3112_s1, %s3108_s20 }
  0x32   :  { %p3115_p9 = por %p3114_p8, %p3113_p7 }
  0x34   :  { %p3116_p10 = pnand %p3115_p9, %p3109_p6 }
  0x36   :  { %3119 = shalt.err (!%p3116_p10)
}
  0x37   :  { %78 = dma.hbm_to_vmem [thread:$0]  %s3792_s8, 16, %s76_s17, [#allocation9]  }
  0x38   :  { %s3128_s23 = scalar_lea.vmem %s88_s19, 16  ;;  %s3132_s3 = scalar_lea.vmem %s88_s19, 32 }
  0x39   :  { %p3129_p11 = scmp.ne.s32.totalorder %s88_s19, %s3128_s23  ;;  %p3133_p12 = scmp.lt.s32.totalorder %s88_s19, %s88_s19 }
  0x3a   :  { %p3134_p13 = scmp.lt.s32.totalorder %s3132_s3, %s3128_s23 }
  0x3c   :  { %p3135_p0 = por %p3134_p13, %p3133_p12 }
  0x3e   :  { %p3136_p1 = pnand %p3135_p0, %p3129_p11 }
  0x40   :  { %3139 = shalt.err (!%p3136_p1)
}
  0x41   :  { %90 = dma.hbm_to_vmem [thread:$0]  %s3794_s10, 16, %s88_s19, [#allocation12]  }
  0x42   :  { %3160 = dma.done.wait [#allocation3], 32  }
  0x43   :  { %3161 = vsyncadd [#allocation3], 4294967264 }
  0x44   :  { %3162 = dma.done.wait [#allocation6], 64  }
  0x45   :  { %3163 = vsyncadd [#allocation6], 4294967232 }
  0x46   :  { %3164 = dma.done.wait [#allocation9], 48  }
  0x47   :  { %3165 = vsyncadd [#allocation9], 4294967248 }
  0x48   :  { %3166 = dma.done.wait [#allocation12], 16  }
  0x49   :  { %3167 = vsyncadd [#allocation12], 4294967280  ;;  %v3176_v0 = vmov 0.0   ;;  %vm3177_vm0 = vmmov 0   ;;  %v3268_v1 = vld [vmem:[%s3789_s5 + $0x18] sm:$0xff]  ;;  %v3273_v2 = vld [vmem:[%s3789_s5 + $0x10] sm:$0xff] }
  0x4a   :  { %2608 = vmatprep.subr.mxu1 %v3176_v0  ;;  %2616 = vmatprep.mubr.msk.f32.mxu1 %vm3177_vm0, %v3176_v0  ;;  %v3280_v3 = vld [vmem:[%s3789_s5 + $0x8] sm:$0xff]  ;;  %v3287_v4 = vld [vmem:[%s3789_s5] sm:$0xff]  ;;  %vm132_vm1 = vcmask 261120   ;;  %s3178_s14 = smov 32   ;;  %v3308_v22 = vld [vmem:[%s3791_s7 + $0x18] sm:$0xff]  ;;  %s3179_s10 = smov 64  }
  0x4b   :  { %2597 = vmatprep.subr.mxu0 %v3176_v0  ;;  %2605 = vmatprep.mubr.msk.f32.mxu0 %vm3177_vm0, %v3176_v0  ;;  %v128_v5 = vld [vmem:[#allocation2] sm:$0x3]  ;;  %v129_v11 = vld [vmem:[#allocation5] sm:$0x3]  ;;  %v3313_v23 = vld [vmem:[%s3791_s7 + $0x10] sm:$0xff]  ;;  %s3180_s17 = smov [#allocation13]  }
  0x4c   :  { %2609 = vmatpush3.msra.mxu1 %v3268_v1  ;;  %v206_v6 = vld [vmem:[%s3784_s0] sm:$0x3]  ;;  %2598 = vmatpush3.msra.mxu0 %v3308_v22  ;;  %v3321_v24 = vld [vmem:[%s3791_s7 + $0x8] sm:$0xff]  ;;  %v130_v26 = vld [vmem:[#allocation7] sm:$0x3]  ;;  %s2410_s18 = sshll.u32 %s3180_s17, 4  ;;  %s2411_s18 = int_to_ptr.vmem [resolvable:$true] %s2410_s18 }
  0x4d   :  { %2610 = vmatprep.subr.mxu1 %v3176_v0  ;;  %2599 = vmatprep.subr.mxu0 %v3176_v0  ;;  %v3330_v25 = vld [vmem:[%s3791_s7] sm:$0xff]  ;;  %v3339_v27 = vld [vmem:[%s3790_s6 + $0x18] sm:$0xff]  ;;  %v3349_v28 = vld [vmem:[%s3790_s6 + $0x10] sm:$0xff]  ;;  %p3145_p3 = scmp.lt.s32.totalorder %s2411_s18, %s2411_s18 }
  0x4e   :  { %2611 = vmatpush3.msra.mxu1 %v3273_v2  ;;  %2600 = vmatpush3.msra.mxu0 %v3313_v23  ;;  %v3358_v30 = vld [vmem:[%s3790_s6 + $0x8] sm:$0xff]  ;;  %v3367_v31 = vld [vmem:[%s3790_s6] sm:$0xff] }
  0x4f   :  { %2612 = vmatprep.subr.mxu1 %v3176_v0  ;;  %2601 = vmatprep.subr.mxu0 %v3176_v0  ;;  %v3396_v37 = vld [vmem:[#allocation10] ss:$0 sm:$0xff]  ;;  %v2429_v42 = vld [vmem:[%s3784_s0 + $0x2] sm:$0x3]  ;;  %v131_v47 = vld [vmem:[#allocation8] sm:$0x3] }
  0x50   :  { %2613 = vmatpush3.msra.mxu1 %v3280_v3  ;;  %2602 = vmatpush3.msra.mxu0 %v3321_v24 }
  0x51   :  { %2614 = vmatprep.subr.mxu1 %v3176_v0  ;;  %2603 = vmatprep.subr.mxu0 %v3176_v0 }
  0x52   :  { %2615 = vmatpush3.msra.mxu1 %v3287_v4  ;;  %2604 = vmatpush3.msra.mxu0 %v3330_v25 }
  0x53   :  { %2617 = vmatmul.mubr.msk.f32.vlgmr.msra.gmra.mxu1 %vm132_vm1, %v128_v5  ;;  %2630 = vmatprep.subr.mxu1 %v3176_v0 }
  0x54   :  { %2638 = vmatprep.mubr.msk.f32.mxu1 %vm3177_vm0, %v3176_v0  ;;  %2631 = vmatpush3.msra.mxu1 %v3308_v22 }
  0x55   :  { %2632 = vmatprep.subr.mxu1 %v3176_v0  ;;  %2606 = vmatmul.mubr.msk.f32.vlgmr.msra.gmra.mxu0 %vm132_vm1, %v130_v26 }
  0x56   :  { %2633 = vmatpush3.msra.mxu1 %v3313_v23  ;;  %2619 = vmatprep.subr.mxu0 %v3176_v0 }
  0x57   :  { %2634 = vmatprep.subr.mxu1 %v3176_v0  ;;  %2620 = vmatpush3.msra.mxu0 %v3339_v27 }
  0x58   :  { %2635 = vmatpush3.msra.mxu1 %v3321_v24  ;;  %2627 = vmatprep.mubr.msk.f32.mxu0 %vm3177_vm0, %v3176_v0 }
  0x59   :  { %2636 = vmatprep.subr.mxu1 %v3176_v0  ;;  %2621 = vmatprep.subr.mxu0 %v3176_v0 }
  0x5a   :  { %2637 = vmatpush3.msra.mxu1 %v3330_v25  ;;  %2622 = vmatpush3.msra.mxu0 %v3349_v28 }
  0x5b   :  { %2652 = vmatprep.subr.mxu1 %v3176_v0  ;;  %2623 = vmatprep.subr.mxu0 %v3176_v0 }
  0x5c   :  { %2624 = vmatpush3.msra.mxu0 %v3358_v30 }
  0x5d   :  { %2625 = vmatprep.subr.mxu0 %v3176_v0 }
  0x5e   :  { %2626 = vmatpush3.msra.mxu0 %v3367_v31 }
  0x5f   :  { %2641 = vmatprep.subr.mxu0 %v3176_v0 }
 0x113   :  { %v276_v7 = vpop.f32.mrf.mxu1 }
 0x114   :  { %v280_v8 = vadd.f32 %v276_v7, %v206_v6 }
 0x115   :  { %v2618_v9 = vpop.f32.mrf.mxu1  ;;  %v202_v34 = vpop.f32.mrf.mxu0 }
 0x116   :  { %2883 = vtanh.f32 %v280_v8  ;;  %v2425_v12 = vmul.f32 -1.442695, %v280_v8 }
 0x117   :  { %v2607_v35 = vpop.f32.mrf.mxu0 }
 0x118   :  { %2885 = vpow2.f32 %v2425_v12 }
 0x123   :  { %v2884_v10 = vpop.eup %2883 }
 0x124   :  { %294 = vrot.lane.b32.xlu0 %v2884_v10, %s3178_s14 }
 0x125   :  { %v2886_v13 = vpop.eup %2885 }
 0x126   :  { %v284_v14 = vadd.f32 1.0, %v2886_v13 }
 0x128   :  { %289 = vrot.lane.b32.xlu0 %v129_v11, %s3178_s14  ;;  %2887 = vrcp.f32 %v284_v14 }
 0x135   :  { %v2888_v15 = vpop.eup %2887 }
 0x196   :  { %v295_v16 = vpop.permute.xlu0 %294 }
 0x197   :  { %v297_v17 = vmul.f32 %v2888_v15, %v295_v16 }
 0x199   :  { %299 = vrot.lane.b32.xlu1 %v297_v17, %s3178_s14 }
 0x19a   :  { %v290_v18 = vpop.permute.xlu0 %289 }
 0x19b   :  { %v292_v19 = vmul.f32 %v2888_v15, %v290_v18 }
 0x20b   :  { %v300_v20 = vpop.permute.xlu1 %299 }
 0x20c   :  { %v3302_v21 = vadd.f32 %v300_v20, %v292_v19 }
 0x20e   :  { %2889 = vtanh.f32 %v3302_v21 }
 0x21b   :  { %v2890_v29 = vpop.eup %2889 }
 0x21c   :  { %305 = vrot.lane.b32.xlu1 %v2890_v29, %s3178_s14  ;;  %v2435_v29 = vld [vmem:[%s3784_s0 + $0x4] sm:$0x3] }
 0x28e   :  { %v306_v32 = vpop.permute.xlu1 %305 }
 0x28f   :  { %v308_v33 = vmul.f32 %v2888_v15, %v306_v32 }
 0x291   :  { %310 = vrot.lane.b32.xlu0 %v308_v33, %s3179_s10 }
 0x303   :  { %v311_v36 = vpop.permute.xlu0 %310 }
 0x304   :  { %2628 = vmatmul.mubr.msk.f32.vlgmr.msra.gmra.mxu0 %vm132_vm1, %v311_v36 }
 0x305   :  { %2642 = vmatpush3.msra.mxu0 %v3268_v1  ;;  %2649 = vmatprep.mubr.msk.f32.mxu0 %vm3177_vm0, %v3176_v0 }
 0x306   :  { %2643 = vmatprep.subr.mxu0 %v3176_v0 }
 0x307   :  { %2644 = vmatpush3.msra.mxu0 %v3273_v2 }
 0x308   :  { %2645 = vmatprep.subr.mxu0 %v3176_v0 }
 0x309   :  { %2646 = vmatpush3.msra.mxu0 %v3280_v3 }
 0x30a   :  { %2647 = vmatprep.subr.mxu0 %v3176_v0 }
 0x30b   :  { %2648 = vmatpush3.msra.mxu0 %v3287_v4 }
 0x30c   :  { %2650 = vmatmul.mubr.msk.f32.vlgmr.msra.gmra.mxu0 %vm132_vm1, %v311_v36  ;;  %2663 = vmatprep.subr.mxu0 %v3176_v0 }
 0x30d   :  { %2664 = vmatpush3.msra.mxu0 %v3308_v22  ;;  %2671 = vmatprep.mubr.msk.f32.mxu0 %vm3177_vm0, %v3176_v0 }
 0x30e   :  { %2665 = vmatprep.subr.mxu0 %v3176_v0 }
 0x30f   :  { %2666 = vmatpush3.msra.mxu0 %v3313_v23 }
 0x310   :  { %2667 = vmatprep.subr.mxu0 %v3176_v0 }
 0x311   :  { %2668 = vmatpush3.msra.mxu0 %v3321_v24 }
 0x312   :  { %2669 = vmatprep.subr.mxu0 %v3176_v0 }
 0x313   :  { %2670 = vmatpush3.msra.mxu0 %v3330_v25 }
 0x314   :  { %2685 = vmatprep.subr.mxu0 %v3176_v0 }
 0x3c4   :  { %v380_v38 = vpop.f32.mrf.mxu0 }
 0x3c5   :  { %v381_v39 = vadd.f32 %v380_v38, %v202_v34 }
 0x3c6   :  { %v2629_v40 = vpop.f32.mrf.mxu0 }
 0x3c7   :  { %v384_v41 = vadd.f32 %v3396_v37, %v381_v39 }
 0x3c9   :  { %2891 = vtanh.f32 %v384_v41  ;;  %v2427_v49 = vmul.f32 -1.442695, %v384_v41 }
 0x3cc   :  { %v556_v43 = vpop.f32.mrf.mxu0 }
 0x3cd   :  { %v560_v44 = vadd.f32 %v2429_v42, %v556_v43 }
 0x3ce   :  { %v2651_v45 = vpop.f32.mrf.mxu0 }
 0x3cf   :  { %2893 = vtanh.f32 %v560_v44  ;;  %v2431_v50 = vmul.f32 -1.442695, %v560_v44 }
 0x3d0   :  { %2895 = vpow2.f32 %v2427_v49 }
 0x3d1   :  { %2897 = vpow2.f32 %v2431_v50 }
 0x3d6   :  { %v2892_v46 = vpop.eup %2891 }
 0x3d7   :  { %398 = vrot.lane.b32.xlu1 %v2892_v46, %s3178_s14 }
 0x3db   :  { %393 = vrot.lane.b32.xlu1 %v131_v47, %s3178_s14 }
 0x3dc   :  { %v2894_v48 = vpop.eup %2893 }
 0x3dd   :  { %570 = vrot.lane.b32.xlu0 %v2894_v48, %s3178_s14  ;;  %v2896_v51 = vpop.eup %2895 }
 0x3de   :  { %v388_v52 = vadd.f32 1.0, %v2896_v51  ;;  %v2898_v53 = vpop.eup %2897 }
 0x3df   :  { %v564_v54 = vadd.f32 1.0, %v2898_v53 }
 0x3e0   :  { %2899 = vrcp.f32 %v388_v52 }
 0x3e1   :  { %2901 = vrcp.f32 %v564_v54 }
 0x3ed   :  { %v2900_v55 = vpop.eup %2899 }
 0x3ee   :  { %v2902_v58 = vpop.eup %2901 }
 0x3ef   :  { %v568_v6 = vmul.f32 %v2902_v58, %v3302_v21 }
 0x449   :  { %v399_v56 = vpop.permute.xlu1 %398 }
 0x44a   :  { %v401_v57 = vmul.f32 %v2900_v55, %v399_v56 }
 0x44c   :  { %403 = vrot.lane.b32.xlu0 %v401_v57, %s3178_s14 }
 0x44d   :  { %v394_v61 = vpop.permute.xlu1 %393 }
 0x44e   :  { %v396_v62 = vmul.f32 %v2900_v55, %v394_v61 }
 0x44f   :  { %v571_v59 = vpop.permute.xlu0 %570 }
 0x450   :  { %v573_v60 = vmul.f32 %v2902_v58, %v571_v59 }
 0x452   :  { %575 = vrot.lane.b32.xlu1 %v573_v60, %s3178_s14 }
 0x4be   :  { %v404_v63 = vpop.permute.xlu0 %403 }
 0x4bf   :  { %v3407_v5 = vadd.f32 %v404_v63, %v396_v62 }
 0x4c1   :  { %2903 = vtanh.f32 %v3407_v5 }
 0x4c4   :  { %v576_v7 = vpop.permute.xlu1 %575 }
 0x4c5   :  { %v3411_v8 = vadd.f32 %v576_v7, %v568_v6 }
 0x4c7   :  { %2905 = vtanh.f32 %v3411_v8 }
 0x4ce   :  { %v2904_v9 = vpop.eup %2903 }
 0x4cf   :  { %409 = vrot.lane.b32.xlu0 %v2904_v9, %s3178_s14 }
 0x4d4   :  { %v2906_v10 = vpop.eup %2905 }
 0x4d5   :  { %581 = vrot.lane.b32.xlu1 %v2906_v10, %s3178_s14 }
 0x541   :  { %v410_v11 = vpop.permute.xlu0 %409 }
 0x542   :  { %v412_v12 = vmul.f32 %v2900_v55, %v410_v11  ;;  %v2441_v11 = vld [vmem:[%s3784_s0 + $0x6] sm:$0x3] }
 0x544   :  { %414 = vrot.lane.b32.xlu0 %v412_v12, %s3179_s10 }
 0x547   :  { %v582_v13 = vpop.permute.xlu1 %581 }
 0x548   :  { %v584_v14 = vmul.f32 %v2902_v58, %v582_v13 }
 0x54a   :  { %586 = vrot.lane.b32.xlu1 %v584_v14, %s3179_s10 }
 0x5b6   :  { %v415_v15 = vpop.permute.xlu0 %414 }
 0x5b7   :  { %2639 = vmatmul.mubr.msk.f32.vlgmr.msra.gmra.mxu1 %vm132_vm1, %v415_v15 }
 0x5b8   :  { %2653 = vmatpush3.msra.mxu1 %v3339_v27  ;;  %2660 = vmatprep.mubr.msk.f32.mxu1 %vm3177_vm0, %v3176_v0 }
 0x5b9   :  { %2654 = vmatprep.subr.mxu1 %v3176_v0 }
 0x5ba   :  { %2655 = vmatpush3.msra.mxu1 %v3349_v28 }
 0x5bb   :  { %2656 = vmatprep.subr.mxu1 %v3176_v0 }
 0x5bc   :  { %2657 = vmatpush3.msra.mxu1 %v3358_v30  ;;  %v587_v16 = vpop.permute.xlu1 %586 }
 0x5bd   :  { %2658 = vmatprep.subr.mxu1 %v3176_v0 }
 0x5be   :  { %2659 = vmatpush3.msra.mxu1 %v3367_v31 }
 0x5bf   :  { %2661 = vmatmul.mubr.msk.f32.vlgmr.msra.gmra.mxu1 %vm132_vm1, %v587_v16  ;;  %2674 = vmatprep.subr.mxu1 %v3176_v0 }
 0x5c0   :  { %2675 = vmatpush3.msra.mxu1 %v3268_v1  ;;  %2682 = vmatprep.mubr.msk.f32.mxu1 %vm3177_vm0, %v3176_v0 }
 0x5c1   :  { %2676 = vmatprep.subr.mxu1 %v3176_v0 }
 0x5c2   :  { %2677 = vmatpush3.msra.mxu1 %v3273_v2 }
 0x5c3   :  { %2678 = vmatprep.subr.mxu1 %v3176_v0 }
 0x5c4   :  { %2679 = vmatpush3.msra.mxu1 %v3280_v3 }
 0x5c5   :  { %2680 = vmatprep.subr.mxu1 %v3176_v0 }
 0x5c6   :  { %2681 = vmatpush3.msra.mxu1 %v3287_v4 }
 0x5c7   :  { %2683 = vmatmul.mubr.msk.f32.vlgmr.msra.gmra.mxu1 %vm132_vm1, %v587_v16  ;;  %2696 = vmatprep.subr.mxu1 %v3176_v0 }
 0x5c8   :  { %2697 = vmatpush3.msra.mxu1 %v3308_v22  ;;  %2704 = vmatprep.mubr.msk.f32.mxu1 %vm3177_vm0, %v3176_v0 }
 0x5c9   :  { %2698 = vmatprep.subr.mxu1 %v3176_v0 }
 0x5ca   :  { %2699 = vmatpush3.msra.mxu1 %v3313_v23 }
 0x5cb   :  { %2700 = vmatprep.subr.mxu1 %v3176_v0 }
 0x5cc   :  { %2701 = vmatpush3.msra.mxu1 %v3321_v24 }
 0x5cd   :  { %2702 = vmatprep.subr.mxu1 %v3176_v0 }
 0x5ce   :  { %2703 = vmatpush3.msra.mxu1 %v3330_v25 }
 0x5cf   :  { %2718 = vmatprep.subr.mxu1 %v3176_v0 }
 0x677   :  { %v484_v17 = vpop.f32.mrf.mxu1 }
 0x679   :  { %v2640_v18 = vpop.f32.mrf.mxu1 }
 0x67f   :  { %v656_v19 = vpop.f32.mrf.mxu1 }
 0x680   :  { %v657_v20 = vadd.f32 %v656_v19, %v484_v17 }
 0x681   :  { %v2662_v21 = vpop.f32.mrf.mxu1 }
 0x682   :  { %v660_v26 = vadd.f32 %v3396_v37, %v657_v20 }
 0x684   :  { %2907 = vtanh.f32 %v660_v26  ;;  %v2433_v38 = vmul.f32 -1.442695, %v660_v26 }
 0x687   :  { %v828_v32 = vpop.f32.mrf.mxu1 }
 0x688   :  { %v832_v33 = vadd.f32 %v2435_v29, %v828_v32 }
 0x689   :  { %v2684_v34 = vpop.f32.mrf.mxu1 }
 0x68a   :  { %2909 = vtanh.f32 %v832_v33  ;;  %v2437_v39 = vmul.f32 -1.442695, %v832_v33 }
 0x68b   :  { %2911 = vpow2.f32 %v2433_v38 }
 0x68c   :  { %2913 = vpow2.f32 %v2437_v39 }
 0x691   :  { %v2908_v35 = vpop.eup %2907 }
 0x692   :  { %670 = vrot.lane.b32.xlu0 %v2908_v35, %s3178_s14 }
 0x697   :  { %v2910_v36 = vpop.eup %2909 }
 0x698   :  { %842 = vrot.lane.b32.xlu1 %v2910_v36, %s3178_s14  ;;  %v2912_v40 = vpop.eup %2911 }
 0x699   :  { %v664_v41 = vadd.f32 1.0, %v2912_v40  ;;  %v2914_v42 = vpop.eup %2913 }
 0x69a   :  { %v836_v43 = vadd.f32 1.0, %v2914_v42 }
 0x69b   :  { %2915 = vrcp.f32 %v664_v41 }
 0x69c   :  { %2917 = vrcp.f32 %v836_v43 }
 0x6a8   :  { %v2916_v44 = vpop.eup %2915 }
 0x6a9   :  { %v2918_v47 = vpop.eup %2917  ;;  %v668_v50 = vmul.f32 %v2916_v44, %v3407_v5 }
 0x6aa   :  { %v840_v53 = vmul.f32 %v2918_v47, %v3411_v8 }
 0x704   :  { %v671_v45 = vpop.permute.xlu0 %670 }
 0x705   :  { %v673_v46 = vmul.f32 %v2916_v44, %v671_v45 }
 0x707   :  { %675 = vrot.lane.b32.xlu0 %v673_v46, %s3178_s14 }
 0x70a   :  { %v843_v48 = vpop.permute.xlu1 %842 }
 0x70b   :  { %v845_v49 = vmul.f32 %v2918_v47, %v843_v48 }
 0x70d   :  { %847 = vrot.lane.b32.xlu1 %v845_v49, %s3178_s14 }
 0x779   :  { %v676_v51 = vpop.permute.xlu0 %675 }
 0x77a   :  { %v3460_v52 = vadd.f32 %v676_v51, %v668_v50 }
 0x77c   :  { %2919 = vtanh.f32 %v3460_v52 }
 0x77f   :  { %v848_v54 = vpop.permute.xlu1 %847 }
 0x780   :  { %v3464_v55 = vadd.f32 %v848_v54, %v840_v53 }
 0x782   :  { %2921 = vtanh.f32 %v3464_v55 }
 0x789   :  { %v2920_v56 = vpop.eup %2919 }
 0x78a   :  { %681 = vrot.lane.b32.xlu0 %v2920_v56, %s3178_s14 }
 0x78f   :  { %v2922_v57 = vpop.eup %2921 }
 0x790   :  { %853 = vrot.lane.b32.xlu1 %v2922_v57, %s3178_s14 }
 0x7fc   :  { %v682_v58 = vpop.permute.xlu0 %681 }
 0x7fd   :  { %v684_v59 = vmul.f32 %v2916_v44, %v682_v58  ;;  %v2447_v58 = vld [vmem:[%s3784_s0 + $0x8] sm:$0x3] }
 0x7ff   :  { %686 = vrot.lane.b32.xlu0 %v684_v59, %s3179_s10 }
 0x802   :  { %v854_v60 = vpop.permute.xlu1 %853 }
 0x803   :  { %v856_v61 = vmul.f32 %v2918_v47, %v854_v60 }
 0x805   :  { %858 = vrot.lane.b32.xlu1 %v856_v61, %s3179_s10 }
 0x871   :  { %v687_v62 = vpop.permute.xlu0 %686 }
 0x872   :  { %2672 = vmatmul.mubr.msk.f32.vlgmr.msra.gmra.mxu0 %vm132_vm1, %v687_v62 }
 0x873   :  { %2686 = vmatpush3.msra.mxu0 %v3339_v27  ;;  %2693 = vmatprep.mubr.msk.f32.mxu0 %vm3177_vm0, %v3176_v0 }
 0x874   :  { %2687 = vmatprep.subr.mxu0 %v3176_v0 }
 0x875   :  { %2688 = vmatpush3.msra.mxu0 %v3349_v28 }
 0x876   :  { %2689 = vmatprep.subr.mxu0 %v3176_v0 }
 0x877   :  { %2690 = vmatpush3.msra.mxu0 %v3358_v30  ;;  %v859_v63 = vpop.permute.xlu1 %858 }
 0x878   :  { %2691 = vmatprep.subr.mxu0 %v3176_v0 }
 0x879   :  { %2692 = vmatpush3.msra.mxu0 %v3367_v31 }
 0x87a   :  { %2694 = vmatmul.mubr.msk.f32.vlgmr.msra.gmra.mxu0 %vm132_vm1, %v859_v63  ;;  %2707 = vmatprep.subr.mxu0 %v3176_v0 }
 0x87b   :  { %2708 = vmatpush3.msra.mxu0 %v3268_v1  ;;  %2715 = vmatprep.mubr.msk.f32.mxu0 %vm3177_vm0, %v3176_v0 }
 0x87c   :  { %2709 = vmatprep.subr.mxu0 %v3176_v0 }
 0x87d   :  { %2710 = vmatpush3.msra.mxu0 %v3273_v2 }
 0x87e   :  { %2711 = vmatprep.subr.mxu0 %v3176_v0 }
 0x87f   :  { %2712 = vmatpush3.msra.mxu0 %v3280_v3 }
 0x880   :  { %2713 = vmatprep.subr.mxu0 %v3176_v0 }
 0x881   :  { %2714 = vmatpush3.msra.mxu0 %v3287_v4 }
 0x882   :  { %2716 = vmatmul.mubr.msk.f32.vlgmr.msra.gmra.mxu0 %vm132_vm1, %v859_v63  ;;  %2729 = vmatprep.subr.mxu0 %v3176_v0 }
 0x883   :  { %2730 = vmatpush3.msra.mxu0 %v3308_v22  ;;  %2737 = vmatprep.mubr.msk.f32.mxu0 %vm3177_vm0, %v3176_v0 }
 0x884   :  { %2731 = vmatprep.subr.mxu0 %v3176_v0 }
 0x885   :  { %2732 = vmatpush3.msra.mxu0 %v3313_v23 }
 0x886   :  { %2733 = vmatprep.subr.mxu0 %v3176_v0 }
 0x887   :  { %2734 = vmatpush3.msra.mxu0 %v3321_v24 }
 0x888   :  { %2735 = vmatprep.subr.mxu0 %v3176_v0 }
 0x889   :  { %2736 = vmatpush3.msra.mxu0 %v3330_v25 }
 0x88a   :  { %2751 = vmatprep.subr.mxu0 %v3176_v0 }
 0x932   :  { %v756_v5 = vpop.f32.mrf.mxu0 }
 0x934   :  { %v2673_v6 = vpop.f32.mrf.mxu0 }
 0x93a   :  { %v928_v7 = vpop.f32.mrf.mxu0 }
 0x93b   :  { %v929_v8 = vadd.f32 %v928_v7, %v756_v5 }
 0x93c   :  { %v2695_v9 = vpop.f32.mrf.mxu0 }
 0x93d   :  { %v932_v10 = vadd.f32 %v3396_v37, %v929_v8 }
 0x93f   :  { %2923 = vtanh.f32 %v932_v10  ;;  %v2439_v17 = vmul.f32 -1.442695, %v932_v10 }
 0x942   :  { %v1100_v12 = vpop.f32.mrf.mxu0 }
 0x943   :  { %v1104_v13 = vadd.f32 %v2441_v11, %v1100_v12 }
 0x944   :  { %v2717_v14 = vpop.f32.mrf.mxu0 }
 0x945   :  { %2925 = vtanh.f32 %v1104_v13  ;;  %v2443_v18 = vmul.f32 -1.442695, %v1104_v13 }
 0x946   :  { %2927 = vpow2.f32 %v2439_v17 }
 0x947   :  { %2929 = vpow2.f32 %v2443_v18 }
 0x94c   :  { %v2924_v15 = vpop.eup %2923 }
 0x94d   :  { %942 = vrot.lane.b32.xlu0 %v2924_v15, %s3178_s14 }
 0x952   :  { %v2926_v16 = vpop.eup %2925 }
 0x953   :  { %1114 = vrot.lane.b32.xlu1 %v2926_v16, %s3178_s14  ;;  %v2928_v19 = vpop.eup %2927 }
 0x954   :  { %v936_v20 = vadd.f32 1.0, %v2928_v19  ;;  %v2930_v21 = vpop.eup %2929 }
 0x955   :  { %v1108_v26 = vadd.f32 1.0, %v2930_v21 }
 0x956   :  { %2931 = vrcp.f32 %v936_v20 }
 0x957   :  { %2933 = vrcp.f32 %v1108_v26 }
 0x963   :  { %v2932_v29 = vpop.eup %2931 }
 0x964   :  { %v2934_v34 = vpop.eup %2933  ;;  %v940_v38 = vmul.f32 %v2932_v29, %v3460_v52 }
 0x965   :  { %v1112_v41 = vmul.f32 %v2934_v34, %v3464_v55 }
 0x9bf   :  { %v943_v32 = vpop.permute.xlu0 %942 }
 0x9c0   :  { %v945_v33 = vmul.f32 %v2932_v29, %v943_v32 }
 0x9c2   :  { %947 = vrot.lane.b32.xlu0 %v945_v33, %s3178_s14 }
 0x9c5   :  { %v1115_v35 = vpop.permute.xlu1 %1114 }
 0x9c6   :  { %v1117_v36 = vmul.f32 %v2934_v34, %v1115_v35 }
 0x9c8   :  { %1119 = vrot.lane.b32.xlu1 %v1117_v36, %s3178_s14 }
 0xa34   :  { %v948_v39 = vpop.permute.xlu0 %947 }
 0xa35   :  { %v3513_v40 = vadd.f32 %v948_v39, %v940_v38 }
 0xa37   :  { %2935 = vtanh.f32 %v3513_v40 }
 0xa3a   :  { %v1120_v42 = vpop.permute.xlu1 %1119 }
 0xa3b   :  { %v3517_v43 = vadd.f32 %v1120_v42, %v1112_v41 }
 0xa3d   :  { %2937 = vtanh.f32 %v3517_v43 }
 0xa44   :  { %v2936_v44 = vpop.eup %2935 }
 0xa45   :  { %953 = vrot.lane.b32.xlu0 %v2936_v44, %s3178_s14 }
 0xa4a   :  { %v2938_v45 = vpop.eup %2937 }
 0xa4b   :  { %1125 = vrot.lane.b32.xlu1 %v2938_v45, %s3178_s14 }
 0xab7   :  { %v954_v46 = vpop.permute.xlu0 %953 }
 0xab8   :  { %v956_v47 = vmul.f32 %v2932_v29, %v954_v46  ;;  %v2453_v46 = vld [vmem:[%s3784_s0 + $0xa] sm:$0x3] }
 0xaba   :  { %958 = vrot.lane.b32.xlu0 %v956_v47, %s3179_s10 }
 0xabd   :  { %v1126_v48 = vpop.permute.xlu1 %1125 }
 0xabe   :  { %v1128_v49 = vmul.f32 %v2934_v34, %v1126_v48 }
 0xac0   :  { %1130 = vrot.lane.b32.xlu1 %v1128_v49, %s3179_s10 }
 0xb2c   :  { %v959_v50 = vpop.permute.xlu0 %958 }
 0xb2d   :  { %2705 = vmatmul.mubr.msk.f32.vlgmr.msra.gmra.mxu1 %vm132_vm1, %v959_v50 }
 0xb2e   :  { %2719 = vmatpush3.msra.mxu1 %v3339_v27  ;;  %2726 = vmatprep.mubr.msk.f32.mxu1 %vm3177_vm0, %v3176_v0 }
 0xb2f   :  { %2720 = vmatprep.subr.mxu1 %v3176_v0 }
 0xb30   :  { %2721 = vmatpush3.msra.mxu1 %v3349_v28 }
 0xb31   :  { %2722 = vmatprep.subr.mxu1 %v3176_v0 }
 0xb32   :  { %2723 = vmatpush3.msra.mxu1 %v3358_v30  ;;  %v1131_v51 = vpop.permute.xlu1 %1130 }
 0xb33   :  { %2724 = vmatprep.subr.mxu1 %v3176_v0 }
 0xb34   :  { %2725 = vmatpush3.msra.mxu1 %v3367_v31 }
 0xb35   :  { %2727 = vmatmul.mubr.msk.f32.vlgmr.msra.gmra.mxu1 %vm132_vm1, %v1131_v51  ;;  %2740 = vmatprep.subr.mxu1 %v3176_v0 }
 0xb36   :  { %2741 = vmatpush3.msra.mxu1 %v3268_v1  ;;  %2748 = vmatprep.mubr.msk.f32.mxu1 %vm3177_vm0, %v3176_v0 }
 0xb37   :  { %2742 = vmatprep.subr.mxu1 %v3176_v0 }
 0xb38   :  { %2743 = vmatpush3.msra.mxu1 %v3273_v2 }
 0xb39   :  { %2744 = vmatprep.subr.mxu1 %v3176_v0 }
 0xb3a   :  { %2745 = vmatpush3.msra.mxu1 %v3280_v3 }
 0xb3b   :  { %2746 = vmatprep.subr.mxu1 %v3176_v0 }
 0xb3c   :  { %2747 = vmatpush3.msra.mxu1 %v3287_v4 }
 0xb3d   :  { %2749 = vmatmul.mubr.msk.f32.vlgmr.msra.gmra.mxu1 %vm132_vm1, %v1131_v51  ;;  %2762 = vmatprep.subr.mxu1 %v3176_v0 }
 0xb3e   :  { %2763 = vmatpush3.msra.mxu1 %v3308_v22  ;;  %2770 = vmatprep.mubr.msk.f32.mxu1 %vm3177_vm0, %v3176_v0 }
 0xb3f   :  { %2764 = vmatprep.subr.mxu1 %v3176_v0 }
 0xb40   :  { %2765 = vmatpush3.msra.mxu1 %v3313_v23 }
 0xb41   :  { %2766 = vmatprep.subr.mxu1 %v3176_v0 }
 0xb42   :  { %2767 = vmatpush3.msra.mxu1 %v3321_v24 }
 0xb43   :  { %2768 = vmatprep.subr.mxu1 %v3176_v0 }
 0xb44   :  { %2769 = vmatpush3.msra.mxu1 %v3330_v25 }
 0xb45   :  { %2784 = vmatprep.subr.mxu1 %v3176_v0 }
 0xbed   :  { %v1028_v52 = vpop.f32.mrf.mxu1 }
 0xbef   :  { %v2706_v53 = vpop.f32.mrf.mxu1 }
 0xbf5   :  { %v1200_v54 = vpop.f32.mrf.mxu1 }
 0xbf6   :  { %v1201_v55 = vadd.f32 %v1200_v54, %v1028_v52 }
 0xbf7   :  { %v2728_v56 = vpop.f32.mrf.mxu1 }
 0xbf8   :  { %v1204_v57 = vadd.f32 %v3396_v37, %v1201_v55 }
 0xbfa   :  { %2939 = vtanh.f32 %v1204_v57  ;;  %v2445_v5 = vmul.f32 -1.442695, %v1204_v57 }
 0xbfd   :  { %v1372_v59 = vpop.f32.mrf.mxu1 }
 0xbfe   :  { %v1376_v60 = vadd.f32 %v2447_v58, %v1372_v59 }
 0xbff   :  { %v2750_v61 = vpop.f32.mrf.mxu1 }
 0xc00   :  { %2941 = vtanh.f32 %v1376_v60  ;;  %v2449_v6 = vmul.f32 -1.442695, %v1376_v60 }
 0xc01   :  { %2943 = vpow2.f32 %v2445_v5 }
 0xc02   :  { %2945 = vpow2.f32 %v2449_v6 }
 0xc07   :  { %v2940_v62 = vpop.eup %2939 }
 0xc08   :  { %1214 = vrot.lane.b32.xlu0 %v2940_v62, %s3178_s14 }
 0xc0d   :  { %v2942_v63 = vpop.eup %2941 }
 0xc0e   :  { %1386 = vrot.lane.b32.xlu1 %v2942_v63, %s3178_s14  ;;  %v2944_v7 = vpop.eup %2943 }
 0xc0f   :  { %v1208_v8 = vadd.f32 1.0, %v2944_v7  ;;  %v2946_v9 = vpop.eup %2945 }
 0xc10   :  { %v1380_v10 = vadd.f32 1.0, %v2946_v9 }
 0xc11   :  { %2947 = vrcp.f32 %v1208_v8 }
 0xc12   :  { %2949 = vrcp.f32 %v1380_v10 }
 0xc1e   :  { %v2948_v11 = vpop.eup %2947 }
 0xc1f   :  { %v2950_v14 = vpop.eup %2949  ;;  %v1212_v17 = vmul.f32 %v2948_v11, %v3513_v40 }
 0xc20   :  { %v1384_v20 = vmul.f32 %v2950_v14, %v3517_v43 }
 0xc7a   :  { %v1215_v12 = vpop.permute.xlu0 %1214 }
 0xc7b   :  { %v1217_v13 = vmul.f32 %v2948_v11, %v1215_v12 }
 0xc7d   :  { %1219 = vrot.lane.b32.xlu0 %v1217_v13, %s3178_s14 }
 0xc80   :  { %v1387_v15 = vpop.permute.xlu1 %1386 }
 0xc81   :  { %v1389_v16 = vmul.f32 %v2950_v14, %v1387_v15 }
 0xc83   :  { %1391 = vrot.lane.b32.xlu1 %v1389_v16, %s3178_s14 }
 0xcef   :  { %v1220_v18 = vpop.permute.xlu0 %1219 }
 0xcf0   :  { %v3566_v19 = vadd.f32 %v1220_v18, %v1212_v17 }
 0xcf2   :  { %2951 = vtanh.f32 %v3566_v19 }
 0xcf5   :  { %v1392_v21 = vpop.permute.xlu1 %1391 }
 0xcf6   :  { %v3570_v26 = vadd.f32 %v1392_v21, %v1384_v20 }
 0xcf8   :  { %2953 = vtanh.f32 %v3570_v26 }
 0xcff   :  { %v2952_v29 = vpop.eup %2951 }
 0xd00   :  { %1225 = vrot.lane.b32.xlu0 %v2952_v29, %s3178_s14 }
 0xd05   :  { %v2954_v32 = vpop.eup %2953 }
 0xd06   :  { %1397 = vrot.lane.b32.xlu1 %v2954_v32, %s3178_s14 }
 0xd72   :  { %v1226_v33 = vpop.permute.xlu0 %1225 }
 0xd73   :  { %v1228_v34 = vmul.f32 %v2948_v11, %v1226_v33 }
 0xd75   :  { %1230 = vrot.lane.b32.xlu0 %v1228_v34, %s3179_s10 }
 0xd78   :  { %v1398_v35 = vpop.permute.xlu1 %1397 }
 0xd79   :  { %v1400_v36 = vmul.f32 %v2950_v14, %v1398_v35 }
 0xd7b   :  { %1402 = vrot.lane.b32.xlu1 %v1400_v36, %s3179_s10 }
 0xde7   :  { %v1231_v38 = vpop.permute.xlu0 %1230 }
 0xde8   :  { %2738 = vmatmul.mubr.msk.f32.vlgmr.msra.gmra.mxu0 %vm132_vm1, %v1231_v38 }
 0xde9   :  { %2752 = vmatpush3.msra.mxu0 %v3339_v27  ;;  %2759 = vmatprep.mubr.msk.f32.mxu0 %vm3177_vm0, %v3176_v0 }
 0xdea   :  { %2753 = vmatprep.subr.mxu0 %v3176_v0 }
 0xdeb   :  { %2754 = vmatpush3.msra.mxu0 %v3349_v28 }
 0xdec   :  { %2755 = vmatprep.subr.mxu0 %v3176_v0 }
 0xded   :  { %2756 = vmatpush3.msra.mxu0 %v3358_v30  ;;  %v1403_v39 = vpop.permute.xlu1 %1402 }
 0xdee   :  { %2757 = vmatprep.subr.mxu0 %v3176_v0 }
 0xdef   :  { %2758 = vmatpush3.msra.mxu0 %v3367_v31 }
 0xdf0   :  { %2760 = vmatmul.mubr.msk.f32.vlgmr.msra.gmra.mxu0 %vm132_vm1, %v1403_v39  ;;  %2773 = vmatprep.subr.mxu0 %v3176_v0 }
 0xdf1   :  { %2774 = vmatpush3.msra.mxu0 %v3268_v1  ;;  %2781 = vmatprep.mubr.msk.f32.mxu0 %vm3177_vm0, %v3176_v0 }
 0xdf2   :  { %2775 = vmatprep.subr.mxu0 %v3176_v0 }
 0xdf3   :  { %2776 = vmatpush3.msra.mxu0 %v3273_v2 }
 0xdf4   :  { %2777 = vmatprep.subr.mxu0 %v3176_v0 }
 0xdf5   :  { %2778 = vmatpush3.msra.mxu0 %v3280_v3 }
 0xdf6   :  { %2779 = vmatprep.subr.mxu0 %v3176_v0 }
 0xdf7   :  { %2780 = vmatpush3.msra.mxu0 %v3287_v4 }
 0xdf8   :  { %2782 = vmatmul.mubr.msk.f32.vlgmr.msra.gmra.mxu0 %vm132_vm1, %v1403_v39  ;;  %2795 = vmatprep.subr.mxu0 %v3176_v0 }
 0xdf9   :  { %2796 = vmatpush3.msra.mxu0 %v3308_v22  ;;  %2803 = vmatprep.mubr.msk.f32.mxu0 %vm3177_vm0, %v3176_v0 }
 0xdfa   :  { %2797 = vmatprep.subr.mxu0 %v3176_v0 }
 0xdfb   :  { %2798 = vmatpush3.msra.mxu0 %v3313_v23 }
 0xdfc   :  { %2799 = vmatprep.subr.mxu0 %v3176_v0 }
 0xdfd   :  { %2800 = vmatpush3.msra.mxu0 %v3321_v24 }
 0xdfe   :  { %2801 = vmatprep.subr.mxu0 %v3176_v0 }
 0xdff   :  { %2802 = vmatpush3.msra.mxu0 %v3330_v25 }
 0xe00   :  { %2817 = vmatprep.subr.mxu0 %v3176_v0 }
 0xea8   :  { %v1300_v40 = vpop.f32.mrf.mxu0 }
 0xeaa   :  { %v2739_v41 = vpop.f32.mrf.mxu0 }
 0xeb0   :  { %v1472_v42 = vpop.f32.mrf.mxu0 }
 0xeb1   :  { %v1473_v43 = vadd.f32 %v1472_v42, %v1300_v40 }
 0xeb2   :  { %v2761_v44 = vpop.f32.mrf.mxu0 }
 0xeb3   :  { %v1476_v45 = vadd.f32 %v3396_v37, %v1473_v43 }
 0xeb5   :  { %2955 = vtanh.f32 %v1476_v45  ;;  %v2451_v52 = vmul.f32 -1.442695, %v1476_v45 }
 0xeb8   :  { %v1644_v47 = vpop.f32.mrf.mxu0 }
 0xeb9   :  { %v1648_v48 = vadd.f32 %v2453_v46, %v1644_v47 }
 0xeba   :  { %v2783_v49 = vpop.f32.mrf.mxu0 }
 0xebb   :  { %2957 = vtanh.f32 %v1648_v48  ;;  %v2455_v53 = vmul.f32 -1.442695, %v1648_v48 }
 0xebc   :  { %2959 = vpow2.f32 %v2451_v52 }
 0xebd   :  { %2961 = vpow2.f32 %v2455_v53  ;;  %v3687_v53 = vld [vmem:[%s3790_s6 + $0x18] sm:$0xff] }
 0xec2   :  { %v2956_v50 = vpop.eup %2955 }
 0xec3   :  { %1486 = vrot.lane.b32.xlu0 %v2956_v50, %s3178_s14 }
 0xec8   :  { %v2958_v51 = vpop.eup %2957 }
 0xec9   :  { %1658 = vrot.lane.b32.xlu1 %v2958_v51, %s3178_s14  ;;  %v2960_v54 = vpop.eup %2959 }
 0xeca   :  { %v1480_v55 = vadd.f32 1.0, %v2960_v54  ;;  %v2962_v56 = vpop.eup %2961  ;;  %v3696_v54 = vld [vmem:[%s3790_s6 + $0x10] sm:$0xff] }
 0xecb   :  { %v1652_v57 = vadd.f32 1.0, %v2962_v56 }
 0xecc   :  { %2963 = vrcp.f32 %v1480_v55  ;;  %v3703_v55 = vld [vmem:[%s3790_s6 + $0x8] sm:$0xff] }
 0xecd   :  { %2965 = vrcp.f32 %v1652_v57  ;;  %v3710_v57 = vld [vmem:[%s3790_s6] sm:$0xff] }
 0xed9   :  { %v2964_v58 = vpop.eup %2963 }
 0xeda   :  { %v2966_v61 = vpop.eup %2965  ;;  %v1484_v5 = vmul.f32 %v2964_v58, %v3566_v19 }
 0xedb   :  { %v1656_v8 = vmul.f32 %v2966_v61, %v3570_v26 }
 0xf35   :  { %v1487_v59 = vpop.permute.xlu0 %1486 }
 0xf36   :  { %v1489_v60 = vmul.f32 %v2964_v58, %v1487_v59  ;;  %v3016_v59 = vld [vmem:[%s3789_s5 + $0x10] sm:$0xff] }
 0xf38   :  { %1491 = vrot.lane.b32.xlu0 %v1489_v60, %s3178_s14  ;;  %v3017_v60 = vld [vmem:[%s3789_s5 + $0x8] sm:$0xff] }
 0xf3b   :  { %v1659_v62 = vpop.permute.xlu1 %1658 }
 0xf3c   :  { %v1661_v63 = vmul.f32 %v2966_v61, %v1659_v62 }
 0xf3e   :  { %1663 = vrot.lane.b32.xlu1 %v1661_v63, %s3178_s14 }
 0xfaa   :  { %v1492_v6 = vpop.permute.xlu0 %1491 }
 0xfab   :  { %v3619_v7 = vadd.f32 %v1492_v6, %v1484_v5 }
 0xfad   :  { %2967 = vtanh.f32 %v3619_v7 }
 0xfb0   :  { %v1664_v9 = vpop.permute.xlu1 %1663 }
 0xfb1   :  { %v3623_v10 = vadd.f32 %v1664_v9, %v1656_v8  ;;  %v2465_v9 = vld [vmem:[%s3784_s0 + $0xe] sm:$0x3] }
 0xfb3   :  { %2969 = vtanh.f32 %v3623_v10 }
 0xfba   :  { %v2968_v11 = vpop.eup %2967 }
 0xfbb   :  { %1497 = vrot.lane.b32.xlu0 %v2968_v11, %s3178_s14 }
 0xfc0   :  { %v2970_v12 = vpop.eup %2969 }
 0xfc1   :  { %1669 = vrot.lane.b32.xlu1 %v2970_v12, %s3178_s14 }
0x102d   :  { %v1498_v13 = vpop.permute.xlu0 %1497 }
0x102e   :  { %v1500_v14 = vmul.f32 %v2964_v58, %v1498_v13  ;;  %v3015_v58 = vld [vmem:[%s3789_s5 + $0x18] sm:$0xff] }
0x1030   :  { %1502 = vrot.lane.b32.xlu0 %v1500_v14, %s3179_s10 }
0x1033   :  { %v1670_v15 = vpop.permute.xlu1 %1669 }
0x1034   :  { %v1672_v16 = vmul.f32 %v2966_v61, %v1670_v15  ;;  %v3018_v61 = vld [vmem:[%s3789_s5] sm:$0xff] }
0x1036   :  { %1674 = vrot.lane.b32.xlu1 %v1672_v16, %s3179_s10 }
0x10a2   :  { %v1503_v17 = vpop.permute.xlu0 %1502 }
0x10a3   :  { %2771 = vmatmul.mubr.msk.f32.vlgmr.msra.gmra.mxu1 %vm132_vm1, %v1503_v17 }
0x10a4   :  { %2785 = vmatpush3.msra.mxu1 %v3339_v27  ;;  %2792 = vmatprep.mubr.msk.f32.mxu1 %vm3177_vm0, %v3176_v0 }
0x10a5   :  { %2786 = vmatprep.subr.mxu1 %v3176_v0 }
0x10a6   :  { %2787 = vmatpush3.msra.mxu1 %v3349_v28 }
0x10a7   :  { %2788 = vmatprep.subr.mxu1 %v3176_v0 }
0x10a8   :  { %2789 = vmatpush3.msra.mxu1 %v3358_v30  ;;  %v1675_v18 = vpop.permute.xlu1 %1674 }
0x10a9   :  { %2790 = vmatprep.subr.mxu1 %v3176_v0 }
0x10aa   :  { %2791 = vmatpush3.msra.mxu1 %v3367_v31 }
0x10ab   :  { %2793 = vmatmul.mubr.msk.f32.vlgmr.msra.gmra.mxu1 %vm132_vm1, %v1675_v18  ;;  %2806 = vmatprep.subr.mxu1 %v3176_v0 }
0x10ac   :  { %2807 = vmatpush3.msra.mxu1 %v3268_v1  ;;  %2814 = vmatprep.mubr.msk.f32.mxu1 %vm3177_vm0, %v3176_v0 }
0x10ad   :  { %2808 = vmatprep.subr.mxu1 %v3176_v0 }
0x10ae   :  { %2809 = vmatpush3.msra.mxu1 %v3273_v2 }
0x10af   :  { %2810 = vmatprep.subr.mxu1 %v3176_v0 }
0x10b0   :  { %2811 = vmatpush3.msra.mxu1 %v3280_v3 }
0x10b1   :  { %2812 = vmatprep.subr.mxu1 %v3176_v0 }
0x10b2   :  { %2813 = vmatpush3.msra.mxu1 %v3287_v4 }
0x10b3   :  { %2815 = vmatmul.mubr.msk.f32.vlgmr.msra.gmra.mxu1 %vm132_vm1, %v1675_v18  ;;  %2828 = vmatprep.subr.mxu1 %v3176_v0 }
0x10b4   :  { %2829 = vmatpush3.msra.mxu1 %v3308_v22  ;;  %2836 = vmatprep.mubr.msk.f32.mxu1 %vm3177_vm0, %v3176_v0 }
0x10b5   :  { %2830 = vmatprep.subr.mxu1 %v3176_v0 }
0x10b6   :  { %2831 = vmatpush3.msra.mxu1 %v3313_v23  ;;  %v2459_v23 = vld [vmem:[%s3784_s0 + $0xc] sm:$0x3] }
0x10b7   :  { %2832 = vmatprep.subr.mxu1 %v3176_v0 }
0x10b8   :  { %2833 = vmatpush3.msra.mxu1 %v3321_v24 }
0x10b9   :  { %2834 = vmatprep.subr.mxu1 %v3176_v0 }
0x10ba   :  { %2835 = vmatpush3.msra.mxu1 %v3330_v25 }
0x10bb   :  { %2850 = vmatprep.subr.mxu1 %v3176_v0 }
0x1163   :  { %v1572_v1 = vpop.f32.mrf.mxu1 }
0x1165   :  { %v2772_v2 = vpop.f32.mrf.mxu1 }
0x116b   :  { %v1744_v3 = vpop.f32.mrf.mxu1 }
0x116c   :  { %v1745_v4 = vadd.f32 %v1744_v3, %v1572_v1 }
0x116d   :  { %v2794_v22 = vpop.f32.mrf.mxu1 }
0x116e   :  { %v1748_v27 = vadd.f32 %v3396_v37, %v1745_v4 }
0x1170   :  { %2971 = vtanh.f32 %v1748_v27  ;;  %v2457_v19 = vmul.f32 -1.442695, %v1748_v27 }
0x1173   :  { %v1916_v28 = vpop.f32.mrf.mxu1 }
0x1174   :  { %v1920_v24 = vadd.f32 %v2459_v23, %v1916_v28 }
0x1175   :  { %v2816_v30 = vpop.f32.mrf.mxu1 }
0x1176   :  { %2973 = vtanh.f32 %v1920_v24  ;;  %v2461_v20 = vmul.f32 -1.442695, %v1920_v24 }
0x1177   :  { %2975 = vpow2.f32 %v2457_v19 }
0x1178   :  { %2977 = vpow2.f32 %v2461_v20 }
0x117d   :  { %v2972_v31 = vpop.eup %2971 }
0x117e   :  { %1758 = vrot.lane.b32.xlu0 %v2972_v31, %s3178_s14 }
0x1183   :  { %v2974_v25 = vpop.eup %2973 }
0x1184   :  { %1930 = vrot.lane.b32.xlu1 %v2974_v25, %s3178_s14  ;;  %v2976_v21 = vpop.eup %2975 }
0x1185   :  { %v1752_v26 = vadd.f32 1.0, %v2976_v21  ;;  %v2978_v29 = vpop.eup %2977 }
0x1186   :  { %v1924_v32 = vadd.f32 1.0, %v2978_v29 }
0x1187   :  { %2979 = vrcp.f32 %v1752_v26 }
0x1188   :  { %2981 = vrcp.f32 %v1924_v32 }
0x1194   :  { %v2980_v33 = vpop.eup %2979 }
0x1195   :  { %v2982_v36 = vpop.eup %2981  ;;  %v1756_v40 = vmul.f32 %v2980_v33, %v3619_v7 }
0x1196   :  { %v1928_v43 = vmul.f32 %v2982_v36, %v3623_v10 }
0x11f0   :  { %v1759_v34 = vpop.permute.xlu0 %1758 }
0x11f1   :  { %v1761_v35 = vmul.f32 %v2980_v33, %v1759_v34 }
0x11f3   :  { %1763 = vrot.lane.b32.xlu0 %v1761_v35, %s3178_s14 }
0x11f6   :  { %v1931_v38 = vpop.permute.xlu1 %1930 }
0x11f7   :  { %v1933_v39 = vmul.f32 %v2982_v36, %v1931_v38 }
0x11f9   :  { %1935 = vrot.lane.b32.xlu1 %v1933_v39, %s3178_s14 }
0x1265   :  { %v1764_v41 = vpop.permute.xlu0 %1763 }
0x1266   :  { %v3672_v42 = vadd.f32 %v1764_v41, %v1756_v40 }
0x1268   :  { %2983 = vtanh.f32 %v3672_v42 }
0x126b   :  { %v1936_v44 = vpop.permute.xlu1 %1935 }
0x126c   :  { %v3676_v45 = vadd.f32 %v1936_v44, %v1928_v43 }
0x126e   :  { %2985 = vtanh.f32 %v3676_v45 }
0x1275   :  { %v2984_v46 = vpop.eup %2983 }
0x1276   :  { %1769 = vrot.lane.b32.xlu0 %v2984_v46, %s3178_s14 }
0x127b   :  { %v2986_v47 = vpop.eup %2985 }
0x127c   :  { %1941 = vrot.lane.b32.xlu1 %v2986_v47, %s3178_s14 }
0x12e8   :  { %v1770_v48 = vpop.permute.xlu0 %1769 }
0x12e9   :  { %v1772_v49 = vmul.f32 %v2980_v33, %v1770_v48 }
0x12eb   :  { %1774 = vrot.lane.b32.xlu0 %v1772_v49, %s3179_s10 }
0x12ee   :  { %v1942_v50 = vpop.permute.xlu1 %1941 }
0x12ef   :  { %v1944_v51 = vmul.f32 %v2982_v36, %v1942_v50 }
0x12f1   :  { %1946 = vrot.lane.b32.xlu1 %v1944_v51, %s3179_s10 }
0x135d   :  { %v1775_v52 = vpop.permute.xlu0 %1774 }
0x135e   :  { %2804 = vmatmul.mubr.msk.f32.vlgmr.msra.gmra.mxu0 %vm132_vm1, %v1775_v52 }
0x135f   :  { %2818 = vmatpush3.msra.mxu0 %v3687_v53  ;;  %2825 = vmatprep.mubr.msk.f32.mxu0 %vm3177_vm0, %v3176_v0 }
0x1360   :  { %2819 = vmatprep.subr.mxu0 %v3176_v0 }
0x1361   :  { %2820 = vmatpush3.msra.mxu0 %v3696_v54 }
0x1362   :  { %2821 = vmatprep.subr.mxu0 %v3176_v0 }
0x1363   :  { %2822 = vmatpush3.msra.mxu0 %v3703_v55  ;;  %v1947_v56 = vpop.permute.xlu1 %1946 }
0x1364   :  { %2823 = vmatprep.subr.mxu0 %v3176_v0 }
0x1365   :  { %2824 = vmatpush3.msra.mxu0 %v3710_v57 }
0x1366   :  { %2826 = vmatmul.mubr.msk.f32.vlgmr.msra.gmra.mxu0 %vm132_vm1, %v1947_v56  ;;  %2839 = vmatprep.subr.mxu0 %v3176_v0 }
0x1367   :  { %2840 = vmatpush3.msra.mxu0 %v3015_v58  ;;  %2847 = vmatprep.mubr.msk.f32.mxu0 %vm3177_vm0, %v3176_v0 }
0x1368   :  { %2841 = vmatprep.subr.mxu0 %v3176_v0 }
0x1369   :  { %2842 = vmatpush3.msra.mxu0 %v3016_v59 }
0x136a   :  { %2843 = vmatprep.subr.mxu0 %v3176_v0 }
0x136b   :  { %2844 = vmatpush3.msra.mxu0 %v3017_v60 }
0x136c   :  { %2845 = vmatprep.subr.mxu0 %v3176_v0 }
0x136d   :  { %2846 = vmatpush3.msra.mxu0 %v3018_v61 }
0x136e   :  { %2848 = vmatmul.mubr.msk.f32.vlgmr.msra.gmra.mxu0 %vm132_vm1, %v1947_v56  ;;  %2861 = vmatprep.subr.mxu0 %v3176_v0  ;;  %v2318_v56 = vld [vmem:[%s3793_s9 + $0x8] sm:$0xff] }
0x136f   :  { %2869 = vmatprep.mubr.msk.f32.mxu0 %vm3177_vm0, %v3176_v0 }
0x141e   :  { %v1844_v62 = vpop.f32.mrf.mxu0 }
0x1420   :  { %v2805_v63 = vpop.f32.mrf.mxu0 }
0x1426   :  { %v2016_v5 = vpop.f32.mrf.mxu0 }
0x1427   :  { %v2017_v6 = vadd.f32 %v2016_v5, %v1844_v62  ;;  %v2470_v62 = vld [vmem:[#allocation11] ss:$0 sm:$0xff] }
0x1428   :  { %v2827_v7 = vpop.f32.mrf.mxu0 }
0x1429   :  { %v2020_v8 = vadd.f32 %v3396_v37, %v2017_v6 }
0x142b   :  { %2987 = vtanh.f32 %v2020_v8  ;;  %v2463_v15 = vmul.f32 -1.442695, %v2020_v8 }
0x142e   :  { %v2188_v10 = vpop.f32.mrf.mxu0 }
0x142f   :  { %v2192_v11 = vadd.f32 %v2465_v9, %v2188_v10 }
0x1430   :  { %v2849_v12 = vpop.f32.mrf.mxu0 }
0x1431   :  { %2989 = vtanh.f32 %v2192_v11  ;;  %v2467_v16 = vmul.f32 -1.442695, %v2192_v11 }
0x1432   :  { %2991 = vpow2.f32 %v2463_v15 }
0x1433   :  { %2993 = vpow2.f32 %v2467_v16 }
0x1438   :  { %v2988_v13 = vpop.eup %2987 }
0x1439   :  { %2030 = vrot.lane.b32.xlu0 %v2988_v13, %s3178_s14 }
0x143e   :  { %v2990_v14 = vpop.eup %2989 }
0x143f   :  { %2202 = vrot.lane.b32.xlu1 %v2990_v14, %s3178_s14  ;;  %v2992_v37 = vpop.eup %2991 }
0x1440   :  { %v2024_v17 = vadd.f32 1.0, %v2992_v37  ;;  %v2994_v18 = vpop.eup %2993 }
0x1441   :  { %v2196_v1 = vadd.f32 1.0, %v2994_v18 }
0x1442   :  { %2995 = vrcp.f32 %v2024_v17 }
0x1443   :  { %2997 = vrcp.f32 %v2196_v1 }
0x144f   :  { %v2996_v2 = vpop.eup %2995 }
0x1450   :  { %v2998_v22 = vpop.eup %2997  ;;  %v2028_v28 = vmul.f32 %v2996_v2, %v3672_v42  ;;  %v3019_v42 = vld [vmem:[#allocation10] ss:$0 sm:$0xff] }
0x1451   :  { %v2200_v31 = vmul.f32 %v2998_v22, %v3676_v45 }
0x14ab   :  { %v2031_v3 = vpop.permute.xlu0 %2030 }
0x14ac   :  { %v2033_v4 = vmul.f32 %v2996_v2, %v2031_v3 }
0x14ae   :  { %2035 = vrot.lane.b32.xlu0 %v2033_v4, %s3178_s14 }
0x14b1   :  { %v2203_v27 = vpop.permute.xlu1 %2202 }
0x14b2   :  { %v2205_v23 = vmul.f32 %v2998_v22, %v2203_v27 }
0x14b4   :  { %2207 = vrot.lane.b32.xlu1 %v2205_v23, %s3178_s14 }
0x1520   :  { %v2036_v24 = vpop.permute.xlu0 %2035 }
0x1521   :  { %v2038_v30 = vadd.f32 %v2036_v24, %v2028_v28 }
0x1523   :  { %2999 = vtanh.f32 %v2038_v30 }
0x1526   :  { %v2208_v25 = vpop.permute.xlu1 %2207 }
0x1527   :  { %v2210_v19 = vadd.f32 %v2208_v25, %v2200_v31 }
0x1529   :  { %3001 = vtanh.f32 %v2210_v19 }
0x1530   :  { %v3000_v20 = vpop.eup %2999 }
0x1531   :  { %2041 = vrot.lane.b32.xlu0 %v3000_v20, %s3178_s14 }
0x1536   :  { %v3002_v21 = vpop.eup %3001 }
0x1537   :  { %2213 = vrot.lane.b32.xlu1 %v3002_v21, %s3178_s14 }
0x15a3   :  { %v2042_v26 = vpop.permute.xlu0 %2041 }
0x15a4   :  { %v2044_v29 = vmul.f32 %v2996_v2, %v2042_v26 }
0x15a6   :  { %2046 = vrot.lane.b32.xlu0 %v2044_v29, %s3179_s10 }
0x15a9   :  { %v2214_v32 = vpop.permute.xlu1 %2213 }
0x15aa   :  { %v2216_v33 = vmul.f32 %v2998_v22, %v2214_v32 }
0x15ac   :  { %2218 = vrot.lane.b32.xlu1 %v2216_v33, %s3179_s10 }
0x1618   :  { %v2047_v34 = vpop.permute.xlu0 %2046 }
0x1619   :  { %2837 = vmatmul.mubr.msk.f32.vlgmr.msra.gmra.mxu1 %vm132_vm1, %v2047_v34 }
0x161a   :  { %2851 = vmatpush3.msra.mxu1 %v3687_v53  ;;  %2858 = vmatprep.mubr.msk.f32.mxu1 %vm3177_vm0, %v3176_v0 }
0x161b   :  { %2852 = vmatprep.subr.mxu1 %v3176_v0 }
0x161c   :  { %2853 = vmatpush3.msra.mxu1 %v3696_v54  ;;  %v2320_v54 = vld [vmem:[%s3793_s9 + $0x18] sm:$0xff] }
0x161d   :  { %2854 = vmatprep.subr.mxu1 %v3176_v0  ;;  %2862 = vmatpush3.msra.mxu0 %v2320_v54 }
0x161e   :  { %2855 = vmatpush3.msra.mxu1 %v3703_v55  ;;  %v2219_v35 = vpop.permute.xlu1 %2218  ;;  %v2319_v55 = vld [vmem:[%s3793_s9 + $0x10] sm:$0xff]  ;;  %2863 = vmatprep.subr.mxu0 %v3176_v0 }
0x161f   :  { %2856 = vmatprep.subr.mxu1 %v3176_v0  ;;  %2864 = vmatpush3.msra.mxu0 %v2319_v55 }
0x1620   :  { %2857 = vmatpush3.msra.mxu1 %v3710_v57  ;;  %2865 = vmatprep.subr.mxu0 %v3176_v0  ;;  %v2317_v57 = vld [vmem:[%s3793_s9] sm:$0xff]  ;;  %s3140_s9 = scalar_lea.vmem %s2411_s18, 32 }
0x1621   :  { %2859 = vmatmul.mubr.msk.f32.vlgmr.msra.gmra.mxu1 %vm132_vm1, %v2219_v35  ;;  %2866 = vmatpush3.msra.mxu0 %v2318_v56  ;;  %p3141_p2 = scmp.ne.s32.totalorder %s2411_s18, %s3140_s9  ;;  %p3146_p4 = scmp.lt.s32.totalorder %s3140_s9, %s3140_s9 }
0x1622   :  { %2867 = vmatprep.subr.mxu0 %v3176_v0 }
0x1623   :  { %2868 = vmatpush3.msra.mxu0 %v2317_v57  ;;  %p3147_p5 = por %p3146_p4, %p3145_p3 }
0x1625   :  { %p3148_p6 = pnand %p3147_p5, %p3141_p2 }
0x16d9   :  { %v2116_v36 = vpop.f32.mrf.mxu1 }
0x16db   :  { %v2838_v38 = vpop.f32.mrf.mxu1 }
0x16e1   :  { %v2288_v39 = vpop.f32.mrf.mxu1 }
0x16e2   :  { %v2289_v40 = vadd.f32 %v2288_v39, %v2116_v36 }
0x16e3   :  { %v2860_v41 = vpop.f32.mrf.mxu1 }
0x16e4   :  { %v2292_v43 = vadd.f32 %v3019_v42, %v2289_v40 }
0x16e6   :  { %3003 = vtanh.f32 %v2292_v43  ;;  %v2469_v45 = vmul.f32 -1.442695, %v2292_v43 }
0x16e8   :  { %3005 = vpow2.f32 %v2469_v45 }
0x16f3   :  { %v3004_v44 = vpop.eup %3003 }
0x16f4   :  { %2302 = vrot.lane.b32.xlu0 %v3004_v44, %s3178_s14 }
0x16f5   :  { %v3006_v46 = vpop.eup %3005 }
0x16f6   :  { %v2296_v47 = vadd.f32 1.0, %v3006_v46 }
0x16f8   :  { %3007 = vrcp.f32 %v2296_v47 }
0x1705   :  { %v3008_v48 = vpop.eup %3007 }
0x1706   :  { %v2300_v51 = vmul.f32 %v3008_v48, %v2038_v30 }
0x1766   :  { %v2303_v49 = vpop.permute.xlu0 %2302 }
0x1767   :  { %v2305_v50 = vmul.f32 %v3008_v48, %v2303_v49 }
0x1769   :  { %2307 = vrot.lane.b32.xlu1 %v2305_v50, %s3178_s14 }
0x17db   :  { %v2308_v52 = vpop.permute.xlu1 %2307 }
0x17dc   :  { %v2310_v53 = vadd.f32 %v2308_v52, %v2300_v51 }
0x17de   :  { %3009 = vtanh.f32 %v2310_v53 }
0x17eb   :  { %v3010_v58 = vpop.eup %3009 }
0x17ec   :  { %2313 = vrot.lane.b32.xlu0 %v3010_v58, %s3178_s14 }
0x185e   :  { %v2314_v59 = vpop.permute.xlu0 %2313 }
0x185f   :  { %v2316_v60 = vmul.f32 %v3008_v48, %v2314_v59 }
0x1861   :  { %2329 = vrot.lane.b32.xlu1 %v2316_v60, %s3179_s10 }
0x18d3   :  { %v2330_v61 = vpop.permute.xlu1 %2329 }
0x18d4   :  { %2870 = vmatmul.mubr.msk.f32.vlgmr.msra.gmra.mxu0 %vm132_vm1, %v2330_v61 }
0x1994   :  { %v2399_v63 = vpop.f32.mrf.mxu0 }
0x1995   :  { %v2400_v5 = vadd.f32 %v2470_v62, %v2399_v63 }
0x1996   :  { %v2871_v6 = vpop.f32.mrf.mxu0 }
0x1997   :  { %2403 = vst [vmem:[#allocation13] sm:$0x3] %v2400_v5 }
0x1998   :  { %3151 = shalt.err (!%p3148_p6)
}
0x1999   :  { %2413 = dma.vmem_to_hbm [thread:$0]  %s2411_s18, 32, %s3795_s11, [#allocation4]  }
0x199a   :  { %3168 = dma.done.wait [#allocation4], 32  }
0x199b   :  { %3169 = vsyncadd [#allocation4], 4294967264 }
0x199c   :  { %2417 = vsyncpa [#allocation3], 1 }
0x199d   :  { %2418 = vsyncpa [#allocation6], 1 }
0x199e   :  { %2419 = vsyncpa [#allocation9], 1 }
0x199f   :  { %2420 = vsyncpa [#allocation12], 1 }
0x19a0   :  { %2421 = vsyncpa [#allocation4], 1 }

</bundles_post_ra>
